<compile_context>
chip_gen: v7x
topology: tpu7x:2x2x1
jax: 0.10.0
libtpu: 0.0.40
codegen_flags: <defaults>
</compile_context>

<pallas_src>
import functools
import math

import jax
import jax.numpy as jnp
from jax.experimental import pallas as pl
from jax.experimental.pallas import tpu as pltpu


def _layer_norm(x, gamma, beta, eps=1e-5):
    # x: (M, D) f32; gamma/beta: (D,) f32.  Biased variance (torch semantics).
    mean = jnp.mean(x, axis=-1, keepdims=True)
    cent = x - mean
    var = jnp.mean(cent * cent, axis=-1, keepdims=True)
    return cent * jax.lax.rsqrt(var + eps) * gamma + beta


def _encoder_layer_kernel(*refs, num_heads, compute_dtype, exp_dtype, self_attn):
    f32 = jnp.float32
    cd = compute_dtype
    approx_recip = jnp.dtype(cd) != jnp.dtype(jnp.float32)

    if self_attn:
        (x_ref, wqkv_ref, wo_ref, w1_ref, w2_ref, vecs_ref, b1_ref, o_ref) = refs
        k_ref = v_ref = None
    else:
        (x_ref, k_ref, v_ref, wqkv_ref, wo_ref, w1_ref, w2_ref,
         vecs_ref, b1_ref, o_ref) = refs

    bb, S, D = x_ref.shape
    M = bb * S
    hd = D // num_heads
    scale = 1.0 / math.sqrt(hd)

    x_in = x_ref[...]                     # (bb, S, D) f32, kept for the residual
    x2 = x_in.reshape(M, D)

    # ---- Q/K/V in-projections: MXU matmuls, low-precision operands, f32 acc.
    #      vecs rows: [bq, bk, bv, bo, g1, be1, b2, g2, be2]
    bq, bk, bv = vecs_ref[0], vecs_ref[1], vecs_ref[2]
    if self_attn:
        qkv = jnp.dot(x2.astype(cd), wqkv_ref[...], preferred_element_type=f32)
        q = qkv[:, 0 * D:1 * D] + bq
        k = qkv[:, 1 * D:2 * D] + bk
        v = qkv[:, 2 * D:3 * D] + bv
    else:
        q = jnp.dot(x2.astype(cd), wqkv_ref[:, 0 * D:1 * D],
                    preferred_element_type=f32) + bq
        k = jnp.dot(k_ref[...].reshape(M, D), wqkv_ref[:, 1 * D:2 * D],
                    preferred_element_type=f32) + bk
        v = jnp.dot(v_ref[...].reshape(M, D), wqkv_ref[:, 2 * D:3 * D],
                    preferred_element_type=f32) + bv

    # Fold the 1/sqrt(head_dim) softmax scale into q once, drop to MXU dtype.
    q = (q * scale).astype(cd).reshape(bb, S, D)
    k = k.astype(cd).reshape(bb, S, D)
    v = v.astype(cd).reshape(bb, S, D)

    # ---- attention with the out-projection folded into the head loop:
    #      acc += softmax(q_h k_h^T) v_h @ Wo[h-slice, :]   (f32 accumulator,
    #      no (S, D) scratch, no masked partial-lane stores).
    acc = jnp.zeros((M, D), f32)
    for h in range(num_heads):
        sl = slice(h * hd, (h + 1) * hd)
        qh, kh, vh = q[:, :, sl], k[:, :, sl], v[:, :, sl]
        s = jnp.einsum("bqd,bkd->bqk", qh, kh, preferred_element_type=f32)
        m = jnp.max(s, axis=-1, keepdims=True)
        p = jnp.exp((s - m).astype(exp_dtype))                 # EUP
        denom = jnp.sum(p.astype(f32), axis=-1, keepdims=True)
        o_h = jnp.einsum("bqk,bkd->bqd", p.astype(cd), vh,
                         preferred_element_type=f32)            # (bb, S, hd) f32
        o_h = o_h * pl.reciprocal(denom, approx=approx_recip)   # after PV matmul
        acc = acc + jnp.dot(o_h.reshape(M, hd).astype(cd), wo_ref[sl, :],
                            preferred_element_type=f32)
    attn = acc + vecs_ref[3]                                    # + bo

    # ---- Residual 1 + LayerNorm (f32) ----
    x1 = _layer_norm(x2 + attn, vecs_ref[4], vecs_ref[5])

    # ---- Feed-forward: Linear -> ReLU -> Linear ----
    h1 = jnp.dot(x1.astype(cd), w1_ref[...], preferred_element_type=f32) + b1_ref[...]
    h1 = jnp.maximum(h1, 0.0)
    ff = jnp.dot(h1.astype(cd), w2_ref[...], preferred_element_type=f32) + vecs_ref[6]

    # ---- Residual 2 + LayerNorm ----
    out = _layer_norm(x1 + ff, vecs_ref[7], vecs_ref[8])
    o_ref[...] = out.reshape(bb, S, D).astype(o_ref.dtype)


@functools.lru_cache(maxsize=1)
def _buffered1_supported():
    """Probe pl.Buffered(1) once with a tiny dummy pallas_call so the real
    kernel never needs a broad exception fallback."""
    try:
        def _copy(x_ref, o_ref):
            o_ref[...] = x_ref[...]
        out = pl.pallas_call(
            _copy,
            out_shape=jax.ShapeDtypeStruct((16, 128), jnp.float32),
            grid=(2,),
            in_specs=[pl.BlockSpec((8, 128), lambda i: (0, 0),
                                   pipeline_mode=pl.Buffered(1))],
            out_specs=pl.BlockSpec((8, 128), lambda i: (i, 0)),
        )(jnp.ones((8, 128), jnp.float32))
        jax.block_until_ready(out)
        return True
    except Exception:   # probe only; the real kernel never falls back
        return False


def _weight_spec(shape, single_buffer):
    index_map = lambda b: (0,) * len(shape)
    if single_buffer:
        # Constant-index weights: one VMEM buffer instead of the default
        # double buffer (matters most on v7x's 64 MiB VMEM).
        return pl.BlockSpec(shape, index_map, pipeline_mode=pl.Buffered(1))
    return pl.BlockSpec(shape, index_map)


def _vmem_cap_bytes():
    # Generation-aware cap: leave ~8 MiB headroom below physical VMEM
    # (64 MiB on v7x, 128 MiB on v5e/v6e); conservative fallback otherwise.
    try:
        cap = int(pltpu.get_tpu_info().vmem_capacity_bytes)
    except Exception:
        cap = 64 << 20
    return max(cap - (8 << 20), 16 << 20)


def _softmax_exp_dtype(compute_dtype):
    # bf16 exp only where the EUP has a bf16 path (v6e / v7x); keep f32 on
    # v5e and older (no bf16 EUP — casts would only add VALU work).
    if jnp.dtype(compute_dtype) != jnp.dtype(jnp.bfloat16):
        return jnp.float32
    try:
        kind = jax.devices()[0].device_kind.lower()
    except Exception:
        return jnp.float32
    if any(v in kind for v in ("v2", "v3", "v4", "v5")):
        return jnp.float32
    return jnp.bfloat16


def _pick_block_b(B, S, target_rows=256):
    # Fill the MXU M dimension (256 rows on v6e/v7x) while keeping at least
    # two grid steps when B >= 2 so v7x's two TensorCores both get work.
    bb = max(1, min(B, target_rows // max(S, 1)))
    if B >= 2:
        bb = max(1, min(bb, (B + 1) // 2))
    return bb


def transformer_encoder_layer(src_q, src_k, src_v, params, num_heads,
                              compute_dtype=jnp.bfloat16, block_b=None):
    """Fused post-norm transformer encoder layer (batch_first), one pallas_call."""
    B, S, D = src_q.shape
    F = params["w1"].shape[1]
    assert D % num_heads == 0

    cd = jnp.dtype(compute_dtype)
    f32 = jnp.float32
    self_attn = (src_k is src_q) and (src_v is src_q)
    exp_dtype = _softmax_exp_dtype(cd)

    # Fused (D, 3D) QKV weight + other MXU weights, cast once to the compute
    # dtype.  The eight (1, D) bias / LayerNorm vectors are packed into a
    # single (9, D) f32 array (one DMA / buffer instead of nine).
    wqkv = jnp.concatenate([params["wq"], params["wk"], params["wv"]], axis=1).astype(cd)
    wo = params["wo"].astype(cd)
    w1 = params["w1"].astype(cd)
    w2 = params["w2"].astype(cd)
    vecs = jnp.concatenate(
        [params["bq"], params["bk"], params["bv"], params["bo"],
         params["g1"], params["be1"], params["b2"], params["g2"], params["be2"]],
        axis=0).astype(f32)                                   # (9, D)
    b1 = params["b1"].astype(f32)                             # (1, F)

    if block_b is None:
        block_b = _pick_block_b(B, S)
    n_steps = -(-B // block_b)
    Bp = n_steps * block_b
    if Bp != B:
        pad = ((0, Bp - B), (0, 0), (0, 0))
        src_q = jnp.pad(src_q, pad)
        if not self_attn:
            src_k = jnp.pad(src_k, pad)
            src_v = jnp.pad(src_v, pad)

    # src_k / src_v are only matmul operands: cast to compute dtype here
    # (halves their DMA + VMEM).  src_q stays f32 for the residual.
    io_map = lambda b: (b, 0, 0)
    if self_attn:
        data_args = (src_q,)
        data_specs = [pl.BlockSpec((block_b, S, D), io_map)]
    else:
        data_args = (src_q, src_k.astype(cd), src_v.astype(cd))
        data_specs = [pl.BlockSpec((block_b, S, D), io_map) for _ in range(3)]

    sb = _buffered1_supported()
    weight_specs = [
        _weight_spec((D, 3 * D), sb),      # wqkv
        _weight_spec((D, D), sb),          # wo
        _weight_spec((D, F), sb),          # w1
        _weight_spec((F, D), sb),          # w2
        _weight_spec((9, D), sb),          # packed biases / LN params
        _weight_spec((1, F), sb),          # b1
    ]
    weight_args = (wqkv, wo, w1, w2, vecs, b1)

    kernel = functools.partial(
        _encoder_layer_kernel, num_heads=num_heads, compute_dtype=cd,
        exp_dtype=exp_dtype, self_attn=self_attn)

    # Advisory cost estimate so XLA schedules around the fused call.
    flops = 2 * Bp * S * (4 * D * D + 2 * S * D + 2 * D * F)
    transcendentals = Bp * num_heads * S * (S + 1) + 2 * Bp * S
    w_bytes = (4 * D * D + 2 * D * F) * cd.itemsize + (9 * D + F) * 4
    in_bytes = Bp * S * D * (4 if self_attn else (4 + 2 * cd.itemsize))
    out_bytes = Bp * S * D * 4
    cost = pl.CostEstimate(flops=int(flops), transcendentals=int(transcendentals),
                           bytes_accessed=int(w_bytes + in_bytes + out_bytes))

    # VMEM budget: weights (worst-case double-buffered) + working set for one
    # (block_b*S)-row slab + double-buffered I/O blocks + slack, capped below
    # the physical VMEM of the current chip generation.
    M = block_b * S
    act_bytes = (4 * M * (6 * D + 2 * F) + cd.itemsize * M * (4 * D + F)
                 + 4 * 3 * block_b * S * S)
    io_bytes = (2 * sum(int(a.size) * a.dtype.itemsize for a in data_args)
                + 2 * Bp * S * D * 4) // n_steps
    want = 2 * w_bytes + act_bytes + io_bytes + (8 << 20)
    vmem_limit = int(max(min(want, _vmem_cap_bytes()), 16 << 20))

    out = pl.pallas_call(
        kernel,
        out_shape=jax.ShapeDtypeStruct((Bp, S, D), src_q.dtype),
        grid_spec=pltpu.PrefetchScalarGridSpec(
            num_scalar_prefetch=0,
            grid=(n_steps,),
            in_specs=data_specs + weight_specs,
            out_specs=pl.BlockSpec((block_b, S, D), io_map),
        ),
        compiler_params=pltpu.CompilerParams(
            dimension_semantics=("parallel",),      # v7x: 2 TCs split the grid
            vmem_limit_bytes=vmem_limit,
        ),
        cost_estimate=cost,
    )(*data_args, *weight_args)
    return out[:B]


def _reference(src_q, src_k, src_v, p, num_heads):
    # Pure-JAX f32 reference with the original module semantics.
    B, S, D = src_q.shape
    H = num_heads
    hd = D // H
    scale = 1.0 / math.sqrt(hd)
    f32 = jnp.float32

    def ln(x, g, b, eps=1e-5):
        mu = jnp.mean(x, axis=-1, keepdims=True)
        var = jnp.mean((x - mu) ** 2, axis=-1, keepdims=True)
        return (x - mu) * jax.lax.rsqrt(var + eps) * g + b

    def mm(a, w):
        return jnp.einsum("bsd,df->bsf", a, w, preferred_element_type=f32)

    q = (mm(src_q, p["wq"]) + p["bq"]).reshape(B, S, H, hd)
    k = (mm(src_k, p["wk"]) + p["bk"]).reshape(B, S, H, hd)
    v = (mm(src_v, p["wv"]) + p["bv"]).reshape(B, S, H, hd)
    s = jnp.einsum("bqhd,bkhd->bhqk", q, k, preferred_element_type=f32) * scale
    a = jax.nn.softmax(s, axis=-1)
    o = jnp.einsum("bhqk,bkhd->bqhd", a, v,
                   preferred_element_type=f32).reshape(B, S, D)
    o = mm(o, p["wo"]) + p["bo"]

    x1 = ln(src_q + o, p["g1"], p["be1"])
    hmid = jnp.maximum(mm(x1, p["w1"]) + p["b1"], 0.0)
    ff = mm(hmid, p["w2"]) + p["b2"]
    return ln(x1 + ff, p["g2"], p["be2"])


def _init_params(key, dim_model, dim_feedforward):
    D, F = dim_model, dim_feedforward
    ks = jax.random.split(key, 12)
    n = lambda k, s: (0.02 * jax.random.normal(k, s)).astype(jnp.float32)
    return {
        "wq": n(ks[0], (D, D)), "wk": n(ks[1], (D, D)), "wv": n(ks[2], (D, D)),
        "bq": n(ks[3], (1, D)), "bk": n(ks[4], (1, D)), "bv": n(ks[5], (1, D)),
        "wo": n(ks[6], (D, D)), "bo": n(ks[7], (1, D)),
        "g1": jnp.ones((1, D), jnp.float32), "be1": jnp.zeros((1, D), jnp.float32),
        "w1": n(ks[8], (D, F)), "b1": n(ks[9], (1, F)),
        "w2": n(ks[10], (F, D)), "b2": n(ks[11], (1, D)),
        "g2": jnp.ones((1, D), jnp.float32), "be2": jnp.zeros((1, D), jnp.float32),
    }


if __name__ == "__main__":
    # batch=4, seq=8, dim_model=128 (lane-dense), heads=4, dim_feedforward=256
    B, S, D, H, F = 4, 8, 128, 4, 256

    key = jax.random.PRNGKey(0)
    kq, kk, kv, kp = jax.random.split(key, 4)
    src_q = jax.random.normal(kq, (B, S, D), jnp.float32)
    src_k = jax.random.normal(kk, (B, S, D), jnp.float32)
    src_v = jax.random.normal(kv, (B, S, D), jnp.float32)
    params = _init_params(kp, D, F)

    # f32 path: original module semantics (strict check).
    out_f32 = jax.block_until_ready(
        transformer_encoder_layer(src_q, src_k, src_v, params,
                                  num_heads=H, compute_dtype=jnp.float32))
    # bf16 fast path: bf16 MXU operands / exp, f32 accumulation & normalizations.
    out_bf16 = jax.block_until_ready(
        transformer_encoder_layer(src_q, src_k, src_v, params,
                                  num_heads=H, compute_dtype=jnp.bfloat16))
    # Self-attention (q is k is v): exercises the fused single-dot QKV path.
    out_self = jax.block_until_ready(
        transformer_encoder_layer(src_q, src_q, src_q, params,
                                  num_heads=H, compute_dtype=jnp.float32))

    ref = _reference(src_q, src_k, src_v, params, H)
    ref_self = _reference(src_q, src_q, src_q, params, H)

    err_f32 = float(jnp.max(jnp.abs(out_f32 - ref)))
    err_self = float(jnp.max(jnp.abs(out_self - ref_self)))
    err_bf16 = float(jnp.max(jnp.abs(out_bf16 - ref)))
    assert err_f32 < 1e-3, f"f32 kernel mismatch vs f32 reference: {err_f32}"
    assert err_self < 1e-3, f"self-attention (fused QKV) mismatch: {err_self}"
    assert err_bf16 < 1e-1, f"bf16 kernel drifted from f32 semantics: {err_bf16}"

    print("KERNEL_OK")
</pallas_src>

<mosaic_0001>
module attributes {stable_mosaic.version = 11 : i64} {
  func.func @_copy(%arg0: i32, %arg1: memref<8x128xf32, #tpu.memory_space<vmem>>, %arg2: memref<8x128xf32, #tpu.memory_space<vmem>>) attributes {dimension_semantics = [#tpu.dimension_semantics<arbitrary>], iteration_bounds = array<i64: 2>, scalar_prefetch = 0 : i64, scratch_operands = 0 : i64, tpu.core_type = #tpu.core_type<tc>, window_params = [{pipeline_mode = #tpu.pipeline_mode<synchronous>, transform_indices = @transform_0, window_bounds = array<i64: 8, 128>}, {transform_indices = @transform_1, window_bounds = array<i64: 8, 128>}]} {
    %c0 = arith.constant 0 : index
    %c0_0 = arith.constant 0 : index
    %0 = vector.load %arg1[%c0, %c0_0] : memref<8x128xf32, #tpu.memory_space<vmem>>, vector<8x128xf32>
    %c0_1 = arith.constant 0 : index
    %c0_2 = arith.constant 0 : index
    %1 = vector.load %arg2[%c0_1, %c0_2] : memref<8x128xf32, #tpu.memory_space<vmem>>, vector<8x128xf32>
    tpu.vector_store %arg2[%c0_1, %c0_2], %0 {strides = array<i32>} : memref<8x128xf32, #tpu.memory_space<vmem>>, vector<8x128xf32>,
    return
  }
  func.func @transform_0(%arg0: i32) -> (i32, i32) {
    %c0_i32 = arith.constant 0 : i32
    %c0_i32_0 = arith.constant 0 : i32
    %c0_i32_1 = arith.constant 0 : i32
    return %c0_i32, %c0_i32_0 : i32, i32
  }
  func.func @transform_1(%arg0: i32) -> (i32, i32) {
    %c0_i32 = arith.constant 0 : i32
    %c0_i32_0 = arith.constant 0 : i32
    return %arg0, %c0_i32 : i32, i32
  }
}

module attributes {stable_mosaic.version = 11 : i64} {
  func.func @_encoder_layer_kernel(%arg0: i32, %arg1: memref<2x8x128xf32, #tpu.memory_space<vmem>>, %arg2: memref<2x8x128xf32, #tpu.memory_space<vmem>>, %arg3: memref<2x8x128xf32, #tpu.memory_space<vmem>>, %arg4: memref<128x384xf32, #tpu.memory_space<vmem>>, %arg5: memref<128x128xf32, #tpu.memory_space<vmem>>, %arg6: memref<128x256xf32, #tpu.memory_space<vmem>>, %arg7: memref<256x128xf32, #tpu.memory_space<vmem>>, %arg8: memref<9x128xf32, #tpu.memory_space<vmem>>, %arg9: memref<1x256xf32, #tpu.memory_space<vmem>>, %arg10: memref<2x8x128xf32, #tpu.memory_space<vmem>>) attributes {dimension_semantics = [#tpu.dimension_semantics<parallel>], iteration_bounds = array<i64: 2>, scalar_prefetch = 0 : i64, scratch_operands = 0 : i64, tpu.core_type = #tpu.core_type<tc>, window_params = [{transform_indices = @transform_0, window_bounds = array<i64: 2, 8, 128>}, {transform_indices = @transform_1, window_bounds = array<i64: 2, 8, 128>}, {transform_indices = @transform_2, window_bounds = array<i64: 2, 8, 128>}, {pipeline_mode = #tpu.pipeline_mode<synchronous>, transform_indices = @transform_3, window_bounds = array<i64: 128, 384>}, {pipeline_mode = #tpu.pipeline_mode<synchronous>, transform_indices = @transform_4, window_bounds = array<i64: 128, 128>}, {pipeline_mode = #tpu.pipeline_mode<synchronous>, transform_indices = @transform_5, window_bounds = array<i64: 128, 256>}, {pipeline_mode = #tpu.pipeline_mode<synchronous>, transform_indices = @transform_6, window_bounds = array<i64: 256, 128>}, {pipeline_mode = #tpu.pipeline_mode<synchronous>, transform_indices = @transform_7, window_bounds = array<i64: 9, 128>}, {pipeline_mode = #tpu.pipeline_mode<synchronous>, transform_indices = @transform_8, window_bounds = array<i64: 1, 256>}, {transform_indices = @transform_9, window_bounds = array<i64: 2, 8, 128>}]} {
    %c0 = arith.constant 0 : index
    %c0_0 = arith.constant 0 : index
    %c0_1 = arith.constant 0 : index
    %0 = vector.load %arg1[%c0, %c0_0, %c0_1] : memref<2x8x128xf32, #tpu.memory_space<vmem>>, vector<2x8x128xf32>
    %1 = vector.shape_cast %0 : vector<2x8x128xf32> to vector<16x128xf32>
    %c0_2 = arith.constant 0 : index
    %c0_3 = arith.constant 0 : index
    %2 = vector.load %arg8[%c0_2, %c0_3] : memref<9x128xf32, #tpu.memory_space<vmem>>, vector<1x128xf32>
    %3 = vector.shape_cast %2 : vector<1x128xf32> to vector<128xf32>
    %c1 = arith.constant 1 : index
    %c0_4 = arith.constant 0 : index
    %4 = vector.load %arg8[%c1, %c0_4] : memref<9x128xf32, #tpu.memory_space<vmem>>, vector<1x128xf32>
    %5 = vector.shape_cast %4 : vector<1x128xf32> to vector<128xf32>
    %c2 = arith.constant 2 : index
    %c0_5 = arith.constant 0 : index
    %6 = vector.load %arg8[%c2, %c0_5] : memref<9x128xf32, #tpu.memory_space<vmem>>, vector<1x128xf32>
    %7 = vector.shape_cast %6 : vector<1x128xf32> to vector<128xf32>
    %c0_6 = arith.constant 0 : index
    %c0_7 = arith.constant 0 : index
    %8 = vector.load %arg4[%c0_6, %c0_7] : memref<128x384xf32, #tpu.memory_space<vmem>>, vector<128x128xf32>
    %cst = arith.constant dense<0.000000e+00> : vector<16x128xf32>
    %9 = tpu.matmul %1, %8, %cst {dimension_numbers = #tpu.dot_dimension_numbers<[1], [0], [0], [1], [0, 0, 1, 1], [], []>} : vector<16x128xf32>, vector<128x128xf32>, vector<16x128xf32> -> vector<16x128xf32>
    %10 = vector.shape_cast %3 : vector<128xf32> to vector<1x128xf32>
    %11 = vector.broadcast %10 : vector<1x128xf32> to vector<16x128xf32>
    %12 = arith.addf %9, %11 : vector<16x128xf32>
    %c0_8 = arith.constant 0 : index
    %c0_9 = arith.constant 0 : index
    %c0_10 = arith.constant 0 : index
    %13 = vector.load %arg2[%c0_8, %c0_9, %c0_10] : memref<2x8x128xf32, #tpu.memory_space<vmem>>, vector<2x8x128xf32>
    %14 = vector.shape_cast %13 : vector<2x8x128xf32> to vector<16x128xf32>
    %c0_11 = arith.constant 0 : index
    %c128 = arith.constant 128 : index
    %15 = vector.load %arg4[%c0_11, %c128] : memref<128x384xf32, #tpu.memory_space<vmem>>, vector<128x128xf32>
    %cst_12 = arith.constant dense<0.000000e+00> : vector<16x128xf32>
    %16 = tpu.matmul %14, %15, %cst_12 {dimension_numbers = #tpu.dot_dimension_numbers<[1], [0], [0], [1], [0, 0, 1, 1], [], []>} : vector<16x128xf32>, vector<128x128xf32>, vector<16x128xf32> -> vector<16x128xf32>
    %17 = vector.shape_cast %5 : vector<128xf32> to vector<1x128xf32>
    %18 = vector.broadcast %17 : vector<1x128xf32> to vector<16x128xf32>
    %19 = arith.addf %16, %18 : vector<16x128xf32>
    %c0_13 = arith.constant 0 : index
    %c0_14 = arith.constant 0 : index
    %c0_15 = arith.constant 0 : index
    %20 = vector.load %arg3[%c0_13, %c0_14, %c0_15] : memref<2x8x128xf32, #tpu.memory_space<vmem>>, vector<2x8x128xf32>
    %21 = vector.shape_cast %20 : vector<2x8x128xf32> to vector<16x128xf32>
    %c0_16 = arith.constant 0 : index
    %c256 = arith.constant 256 : index
    %22 = vector.load %arg4[%c0_16, %c256] : memref<128x384xf32, #tpu.memory_space<vmem>>, vector<128x128xf32>
    %cst_17 = arith.constant dense<0.000000e+00> : vector<16x128xf32>
    %23 = tpu.matmul %21, %22, %cst_17 {dimension_numbers = #tpu.dot_dimension_numbers<[1], [0], [0], [1], [0, 0, 1, 1], [], []>} : vector<16x128xf32>, vector<128x128xf32>, vector<16x128xf32> -> vector<16x128xf32>
    %24 = vector.shape_cast %7 : vector<128xf32> to vector<1x128xf32>
    %25 = vector.broadcast %24 : vector<1x128xf32> to vector<16x128xf32>
    %26 = arith.addf %23, %25 : vector<16x128xf32>
    %cst_18 = arith.constant 0.176776692 : f32
    %27 = vector.broadcast %cst_18 : f32 to vector<16x128xf32>
    %28 = arith.mulf %12, %27 : vector<16x128xf32>
    %29 = vector.shape_cast %28 : vector<16x128xf32> to vector<2x8x128xf32>
    %30 = vector.shape_cast %19 : vector<16x128xf32> to vector<2x8x128xf32>
    %31 = vector.shape_cast %26 : vector<16x128xf32> to vector<2x8x128xf32>
    %cst_19 = arith.constant 0.000000e+00 : f32
    %32 = vector.broadcast %cst_19 : f32 to vector<16x128xf32>
    %33 = vector.extract_strided_slice %29 {offsets = [0, 0, 0], sizes = [2, 8, 32], strides = [1, 1, 1]} : vector<2x8x128xf32> to vector<2x8x32xf32>
    %34 = vector.extract_strided_slice %30 {offsets = [0, 0, 0], sizes = [2, 8, 32], strides = [1, 1, 1]} : vector<2x8x128xf32> to vector<2x8x32xf32>
    %35 = vector.extract_strided_slice %31 {offsets = [0, 0, 0], sizes = [2, 8, 32], strides = [1, 1, 1]} : vector<2x8x128xf32> to vector<2x8x32xf32>
    "tpu.trace_start"() <{level = 10 : i32, message = "bqd,bkd->bqk"}> : () -> ()
    %cst_20 = arith.constant dense<0.000000e+00> : vector<2x8x8xf32>
    %36 = tpu.matmul %33, %34, %cst_20 {dimension_numbers = #tpu.dot_dimension_numbers<[2], [2], [1], [1], [0, 0, 0, 1, 1, 1], [0], [0]>} : vector<2x8x32xf32>, vector<2x8x32xf32>, vector<2x8x8xf32> -> vector<2x8x8xf32>
    "tpu.trace_stop"() : () -> ()
    %cst_21 = arith.constant dense<0xFF800000> : vector<2x8xf32>
    %37 = vector.multi_reduction <maximumf>, %36, %cst_21 [2] : vector<2x8x8xf32> to vector<2x8xf32>
    %38 = vector.shape_cast %37 : vector<2x8xf32> to vector<2x8x1xf32>
    %39 = vector.broadcast %38 : vector<2x8x1xf32> to vector<2x8x8xf32>
    %40 = arith.subf %36, %39 : vector<2x8x8xf32>
    %41 = math.exp %40 : vector<2x8x8xf32>
    %cst_22 = arith.constant dense<0.000000e+00> : vector<2x8xf32>
    %42 = vector.multi_reduction <add>, %41, %cst_22 [2] : vector<2x8x8xf32> to vector<2x8xf32>
    %43 = vector.shape_cast %42 : vector<2x8xf32> to vector<2x8x1xf32>
    "tpu.trace_start"() <{level = 10 : i32, message = "bqk,bkd->bqd"}> : () -> ()
    %cst_23 = arith.constant dense<0.000000e+00> : vector<2x8x32xf32>
    %44 = tpu.matmul %41, %35, %cst_23 {dimension_numbers = #tpu.dot_dimension_numbers<[2], [1], [1], [2], [0, 0, 0, 1, 1, 2], [0], [0]>} : vector<2x8x8xf32>, vector<2x8x32xf32>, vector<2x8x32xf32> -> vector<2x8x32xf32>
    "tpu.trace_stop"() : () -> ()
    %45 = tpu.reciprocal %43 : vector<2x8x1xf32> -> vector<2x8x1xf32>
    %46 = vector.broadcast %45 : vector<2x8x1xf32> to vector<2x8x32xf32>
    %47 = arith.mulf %44, %46 : vector<2x8x32xf32>
    %48 = vector.shape_cast %47 : vector<2x8x32xf32> to vector<16x32xf32>
    %c0_24 = arith.constant 0 : index
    %c0_25 = arith.constant 0 : index
    %49 = vector.load %arg5[%c0_24, %c0_25] : memref<128x128xf32, #tpu.memory_space<vmem>>, vector<32x128xf32>
    %cst_26 = arith.constant dense<0.000000e+00> : vector<16x128xf32>
    %50 = tpu.matmul %48, %49, %cst_26 {dimension_numbers = #tpu.dot_dimension_numbers<[1], [0], [0], [1], [0, 0, 1, 1], [], []>} : vector<16x32xf32>, vector<32x128xf32>, vector<16x128xf32> -> vector<16x128xf32>
    %51 = arith.addf %32, %50 : vector<16x128xf32>
    %52 = vector.extract_strided_slice %29 {offsets = [0, 0, 32], sizes = [2, 8, 32], strides = [1, 1, 1]} : vector<2x8x128xf32> to vector<2x8x32xf32>
    %53 = vector.extract_strided_slice %30 {offsets = [0, 0, 32], sizes = [2, 8, 32], strides = [1, 1, 1]} : vector<2x8x128xf32> to vector<2x8x32xf32>
    %54 = vector.extract_strided_slice %31 {offsets = [0, 0, 32], sizes = [2, 8, 32], strides = [1, 1, 1]} : vector<2x8x128xf32> to vector<2x8x32xf32>
    "tpu.trace_start"() <{level = 10 : i32, message = "bqd,bkd->bqk"}> : () -> ()
    %cst_27 = arith.constant dense<0.000000e+00> : vector<2x8x8xf32>
    %55 = tpu.matmul %52, %53, %cst_27 {dimension_numbers = #tpu.dot_dimension_numbers<[2], [2], [1], [1], [0, 0, 0, 1, 1, 1], [0], [0]>} : vector<2x8x32xf32>, vector<2x8x32xf32>, vector<2x8x8xf32> -> vector<2x8x8xf32>
    "tpu.trace_stop"() : () -> ()
    %cst_28 = arith.constant dense<0xFF800000> : vector<2x8xf32>
    %56 = vector.multi_reduction <maximumf>, %55, %cst_28 [2] : vector<2x8x8xf32> to vector<2x8xf32>
    %57 = vector.shape_cast %56 : vector<2x8xf32> to vector<2x8x1xf32>
    %58 = vector.broadcast %57 : vector<2x8x1xf32> to vector<2x8x8xf32>
    %59 = arith.subf %55, %58 : vector<2x8x8xf32>
    %60 = math.exp %59 : vector<2x8x8xf32>
    %cst_29 = arith.constant dense<0.000000e+00> : vector<2x8xf32>
    %61 = vector.multi_reduction <add>, %60, %cst_29 [2] : vector<2x8x8xf32> to vector<2x8xf32>
    %62 = vector.shape_cast %61 : vector<2x8xf32> to vector<2x8x1xf32>
    "tpu.trace_start"() <{level = 10 : i32, message = "bqk,bkd->bqd"}> : () -> ()
    %cst_30 = arith.constant dense<0.000000e+00> : vector<2x8x32xf32>
    %63 = tpu.matmul %60, %54, %cst_30 {dimension_numbers = #tpu.dot_dimension_numbers<[2], [1], [1], [2], [0, 0, 0, 1, 1, 2], [0], [0]>} : vector<2x8x8xf32>, vector<2x8x32xf32>, vector<2x8x32xf32> -> vector<2x8x32xf32>
    "tpu.trace_stop"() : () -> ()
    %64 = tpu.reciprocal %62 : vector<2x8x1xf32> -> vector<2x8x1xf32>
    %65 = vector.broadcast %64 : vector<2x8x1xf32> to vector<2x8x32xf32>
    %66 = arith.mulf %63, %65 : vector<2x8x32xf32>
    %67 = vector.shape_cast %66 : vector<2x8x32xf32> to vector<16x32xf32>
    %c32 = arith.constant 32 : index
    %c0_31 = arith.constant 0 : index
    %68 = vector.load %arg5[%c32, %c0_31] : memref<128x128xf32, #tpu.memory_space<vmem>>, vector<32x128xf32>
    %cst_32 = arith.constant dense<0.000000e+00> : vector<16x128xf32>
    %69 = tpu.matmul %67, %68, %cst_32 {dimension_numbers = #tpu.dot_dimension_numbers<[1], [0], [0], [1], [0, 0, 1, 1], [], []>} : vector<16x32xf32>, vector<32x128xf32>, vector<16x128xf32> -> vector<16x128xf32>
    %70 = arith.addf %51, %69 : vector<16x128xf32>
    %71 = vector.extract_strided_slice %29 {offsets = [0, 0, 64], sizes = [2, 8, 32], strides = [1, 1, 1]} : vector<2x8x128xf32> to vector<2x8x32xf32>
    %72 = vector.extract_strided_slice %30 {offsets = [0, 0, 64], sizes = [2, 8, 32], strides = [1, 1, 1]} : vector<2x8x128xf32> to vector<2x8x32xf32>
    %73 = vector.extract_strided_slice %31 {offsets = [0, 0, 64], sizes = [2, 8, 32], strides = [1, 1, 1]} : vector<2x8x128xf32> to vector<2x8x32xf32>
    "tpu.trace_start"() <{level = 10 : i32, message = "bqd,bkd->bqk"}> : () -> ()
    %cst_33 = arith.constant dense<0.000000e+00> : vector<2x8x8xf32>
    %74 = tpu.matmul %71, %72, %cst_33 {dimension_numbers = #tpu.dot_dimension_numbers<[2], [2], [1], [1], [0, 0, 0, 1, 1, 1], [0], [0]>} : vector<2x8x32xf32>, vector<2x8x32xf32>, vector<2x8x8xf32> -> vector<2x8x8xf32>
    "tpu.trace_stop"() : () -> ()
    %cst_34 = arith.constant dense<0xFF800000> : vector<2x8xf32>
    %75 = vector.multi_reduction <maximumf>, %74, %cst_34 [2] : vector<2x8x8xf32> to vector<2x8xf32>
    %76 = vector.shape_cast %75 : vector<2x8xf32> to vector<2x8x1xf32>
    %77 = vector.broadcast %76 : vector<2x8x1xf32> to vector<2x8x8xf32>
    %78 = arith.subf %74, %77 : vector<2x8x8xf32>
    %79 = math.exp %78 : vector<2x8x8xf32>
    %cst_35 = arith.constant dense<0.000000e+00> : vector<2x8xf32>
    %80 = vector.multi_reduction <add>, %79, %cst_35 [2] : vector<2x8x8xf32> to vector<2x8xf32>
    %81 = vector.shape_cast %80 : vector<2x8xf32> to vector<2x8x1xf32>
    "tpu.trace_start"() <{level = 10 : i32, message = "bqk,bkd->bqd"}> : () -> ()
    %cst_36 = arith.constant dense<0.000000e+00> : vector<2x8x32xf32>
    %82 = tpu.matmul %79, %73, %cst_36 {dimension_numbers = #tpu.dot_dimension_numbers<[2], [1], [1], [2], [0, 0, 0, 1, 1, 2], [0], [0]>} : vector<2x8x8xf32>, vector<2x8x32xf32>, vector<2x8x32xf32> -> vector<2x8x32xf32>
    "tpu.trace_stop"() : () -> ()
    %83 = tpu.reciprocal %81 : vector<2x8x1xf32> -> vector<2x8x1xf32>
    %84 = vector.broadcast %83 : vector<2x8x1xf32> to vector<2x8x32xf32>
    %85 = arith.mulf %82, %84 : vector<2x8x32xf32>
    %86 = vector.shape_cast %85 : vector<2x8x32xf32> to vector<16x32xf32>
    %c64 = arith.constant 64 : index
    %c0_37 = arith.constant 0 : index
    %87 = vector.load %arg5[%c64, %c0_37] : memref<128x128xf32, #tpu.memory_space<vmem>>, vector<32x128xf32>
    %cst_38 = arith.constant dense<0.000000e+00> : vector<16x128xf32>
    %88 = tpu.matmul %86, %87, %cst_38 {dimension_numbers = #tpu.dot_dimension_numbers<[1], [0], [0], [1], [0, 0, 1, 1], [], []>} : vector<16x32xf32>, vector<32x128xf32>, vector<16x128xf32> -> vector<16x128xf32>
    %89 = arith.addf %70, %88 : vector<16x128xf32>
    %90 = vector.extract_strided_slice %29 {offsets = [0, 0, 96], sizes = [2, 8, 32], strides = [1, 1, 1]} : vector<2x8x128xf32> to vector<2x8x32xf32>
    %91 = vector.extract_strided_slice %30 {offsets = [0, 0, 96], sizes = [2, 8, 32], strides = [1, 1, 1]} : vector<2x8x128xf32> to vector<2x8x32xf32>
    %92 = vector.extract_strided_slice %31 {offsets = [0, 0, 96], sizes = [2, 8, 32], strides = [1, 1, 1]} : vector<2x8x128xf32> to vector<2x8x32xf32>
    "tpu.trace_start"() <{level = 10 : i32, message = "bqd,bkd->bqk"}> : () -> ()
    %cst_39 = arith.constant dense<0.000000e+00> : vector<2x8x8xf32>
    %93 = tpu.matmul %90, %91, %cst_39 {dimension_numbers = #tpu.dot_dimension_numbers<[2], [2], [1], [1], [0, 0, 0, 1, 1, 1], [0], [0]>} : vector<2x8x32xf32>, vector<2x8x32xf32>, vector<2x8x8xf32> -> vector<2x8x8xf32>
    "tpu.trace_stop"() : () -> ()
    %cst_40 = arith.constant dense<0xFF800000> : vector<2x8xf32>
    %94 = vector.multi_reduction <maximumf>, %93, %cst_40 [2] : vector<2x8x8xf32> to vector<2x8xf32>
    %95 = vector.shape_cast %94 : vector<2x8xf32> to vector<2x8x1xf32>
    %96 = vector.broadcast %95 : vector<2x8x1xf32> to vector<2x8x8xf32>
    %97 = arith.subf %93, %96 : vector<2x8x8xf32>
    %98 = math.exp %97 : vector<2x8x8xf32>
    %cst_41 = arith.constant dense<0.000000e+00> : vector<2x8xf32>
    %99 = vector.multi_reduction <add>, %98, %cst_41 [2] : vector<2x8x8xf32> to vector<2x8xf32>
    %100 = vector.shape_cast %99 : vector<2x8xf32> to vector<2x8x1xf32>
    "tpu.trace_start"() <{level = 10 : i32, message = "bqk,bkd->bqd"}> : () -> ()
    %cst_42 = arith.constant dense<0.000000e+00> : vector<2x8x32xf32>
    %101 = tpu.matmul %98, %92, %cst_42 {dimension_numbers = #tpu.dot_dimension_numbers<[2], [1], [1], [2], [0, 0, 0, 1, 1, 2], [0], [0]>} : vector<2x8x8xf32>, vector<2x8x32xf32>, vector<2x8x32xf32> -> vector<2x8x32xf32>
    "tpu.trace_stop"() : () -> ()
    %102 = tpu.reciprocal %100 : vector<2x8x1xf32> -> vector<2x8x1xf32>
    %103 = vector.broadcast %102 : vector<2x8x1xf32> to vector<2x8x32xf32>
    %104 = arith.mulf %101, %103 : vector<2x8x32xf32>
    %105 = vector.shape_cast %104 : vector<2x8x32xf32> to vector<16x32xf32>
    %c96 = arith.constant 96 : index
    %c0_43 = arith.constant 0 : index
    %106 = vector.load %arg5[%c96, %c0_43] : memref<128x128xf32, #tpu.memory_space<vmem>>, vector<32x128xf32>
    %cst_44 = arith.constant dense<0.000000e+00> : vector<16x128xf32>
    %107 = tpu.matmul %105, %106, %cst_44 {dimension_numbers = #tpu.dot_dimension_numbers<[1], [0], [0], [1], [0, 0, 1, 1], [], []>} : vector<16x32xf32>, vector<32x128xf32>, vector<16x128xf32> -> vector<16x128xf32>
    %108 = arith.addf %89, %107 : vector<16x128xf32>
    %c3 = arith.constant 3 : index
    %c0_45 = arith.constant 0 : index
    %109 = vector.load %arg8[%c3, %c0_45] : memref<9x128xf32, #tpu.memory_space<vmem>>, vector<1x128xf32>
    %110 = vector.shape_cast %109 : vector<1x128xf32> to vector<128xf32>
    %111 = vector.shape_cast %110 : vector<128xf32> to vector<1x128xf32>
    %112 = vector.broadcast %111 : vector<1x128xf32> to vector<16x128xf32>
    %113 = arith.addf %108, %112 : vector<16x128xf32>
    %114 = arith.addf %1, %113 : vector<16x128xf32>
    %c4 = arith.constant 4 : index
    %c0_46 = arith.constant 0 : index
    %115 = vector.load %arg8[%c4, %c0_46] : memref<9x128xf32, #tpu.memory_space<vmem>>, vector<1x128xf32>
    %116 = vector.shape_cast %115 : vector<1x128xf32> to vector<128xf32>
    %c5 = arith.constant 5 : index
    %c0_47 = arith.constant 0 : index
    %117 = vector.load %arg8[%c5, %c0_47] : memref<9x128xf32, #tpu.memory_space<vmem>>, vector<1x128xf32>
    %118 = vector.shape_cast %117 : vector<1x128xf32> to vector<128xf32>
    %cst_48 = arith.constant dense<0.000000e+00> : vector<16xf32>
    %119 = vector.multi_reduction <add>, %114, %cst_48 [1] : vector<16x128xf32> to vector<16xf32>
    %120 = vector.shape_cast %119 : vector<16xf32> to vector<16x1xf32>
    %cst_49 = arith.constant 1.280000e+02 : f32
    %121 = vector.broadcast %cst_49 : f32 to vector<16x1xf32>
    %122 = arith.divf %120, %121 : vector<16x1xf32>
    %123 = vector.broadcast %122 : vector<16x1xf32> to vector<16x128xf32>
    %124 = arith.subf %114, %123 : vector<16x128xf32>
    %125 = arith.mulf %124, %124 : vector<16x128xf32>
    %cst_50 = arith.constant dense<0.000000e+00> : vector<16xf32>
    %126 = vector.multi_reduction <add>, %125, %cst_50 [1] : vector<16x128xf32> to vector<16xf32>
    %127 = vector.shape_cast %126 : vector<16xf32> to vector<16x1xf32>
    %cst_51 = arith.constant 1.280000e+02 : f32
    %128 = vector.broadcast %cst_51 : f32 to vector<16x1xf32>
    %129 = arith.divf %127, %128 : vector<16x1xf32>
    %cst_52 = arith.constant 9.99999974E-6 : f32
    %130 = vector.broadcast %cst_52 : f32 to vector<16x1xf32>
    %131 = arith.addf %129, %130 : vector<16x1xf32>
    %132 = math.rsqrt %131 : vector<16x1xf32>
    %133 = vector.broadcast %132 : vector<16x1xf32> to vector<16x128xf32>
    %134 = arith.mulf %124, %133 : vector<16x128xf32>
    %135 = vector.shape_cast %116 : vector<128xf32> to vector<1x128xf32>
    %136 = vector.broadcast %135 : vector<1x128xf32> to vector<16x128xf32>
    %137 = arith.mulf %134, %136 : vector<16x128xf32>
    %138 = vector.shape_cast %118 : vector<128xf32> to vector<1x128xf32>
    %139 = vector.broadcast %138 : vector<1x128xf32> to vector<16x128xf32>
    %140 = arith.addf %137, %139 : vector<16x128xf32>
    %c0_53 = arith.constant 0 : index
    %c0_54 = arith.constant 0 : index
    %141 = vector.load %arg6[%c0_53, %c0_54] : memref<128x256xf32, #tpu.memory_space<vmem>>, vector<128x256xf32>
    %cst_55 = arith.constant dense<0.000000e+00> : vector<16x256xf32>
    %142 = tpu.matmul %140, %141, %cst_55 {dimension_numbers = #tpu.dot_dimension_numbers<[1], [0], [0], [1], [0, 0, 1, 1], [], []>} : vector<16x128xf32>, vector<128x256xf32>, vector<16x256xf32> -> vector<16x256xf32>
    %c0_56 = arith.constant 0 : index
    %c0_57 = arith.constant 0 : index
    %143 = vector.load %arg9[%c0_56, %c0_57] : memref<1x256xf32, #tpu.memory_space<vmem>>, vector<1x256xf32>
    %144 = vector.broadcast %143 : vector<1x256xf32> to vector<16x256xf32>
    %145 = arith.addf %142, %144 : vector<16x256xf32>
    %cst_58 = arith.constant 0.000000e+00 : f32
    %146 = vector.broadcast %cst_58 : f32 to vector<16x256xf32>
    %147 = arith.maximumf %145, %146 : vector<16x256xf32>
    %c0_59 = arith.constant 0 : index
    %c0_60 = arith.constant 0 : index
    %148 = vector.load %arg7[%c0_59, %c0_60] : memref<256x128xf32, #tpu.memory_space<vmem>>, vector<256x128xf32>
    %cst_61 = arith.constant dense<0.000000e+00> : vector<16x128xf32>
    %149 = tpu.matmul %147, %148, %cst_61 {dimension_numbers = #tpu.dot_dimension_numbers<[1], [0], [0], [1], [0, 0, 1, 1], [], []>} : vector<16x256xf32>, vector<256x128xf32>, vector<16x128xf32> -> vector<16x128xf32>
    %c6 = arith.constant 6 : index
    %c0_62 = arith.constant 0 : index
    %150 = vector.load %arg8[%c6, %c0_62] : memref<9x128xf32, #tpu.memory_space<vmem>>, vector<1x128xf32>
    %151 = vector.shape_cast %150 : vector<1x128xf32> to vector<128xf32>
    %152 = vector.shape_cast %151 : vector<128xf32> to vector<1x128xf32>
    %153 = vector.broadcast %152 : vector<1x128xf32> to vector<16x128xf32>
    %154 = arith.addf %149, %153 : vector<16x128xf32>
    %155 = arith.addf %140, %154 : vector<16x128xf32>
    %c7 = arith.constant 7 : index
    %c0_63 = arith.constant 0 : index
    %156 = vector.load %arg8[%c7, %c0_63] : memref<9x128xf32, #tpu.memory_space<vmem>>, vector<1x128xf32>
    %157 = vector.shape_cast %156 : vector<1x128xf32> to vector<128xf32>
    %c8 = arith.constant 8 : index
    %c0_64 = arith.constant 0 : index
    %158 = vector.load %arg8[%c8, %c0_64] : memref<9x128xf32, #tpu.memory_space<vmem>>, vector<1x128xf32>
    %159 = vector.shape_cast %158 : vector<1x128xf32> to vector<128xf32>
    %cst_65 = arith.constant dense<0.000000e+00> : vector<16xf32>
    %160 = vector.multi_reduction <add>, %155, %cst_65 [1] : vector<16x128xf32> to vector<16xf32>
    %161 = vector.shape_cast %160 : vector<16xf32> to vector<16x1xf32>
    %cst_66 = arith.constant 1.280000e+02 : f32
    %162 = vector.broadcast %cst_66 : f32 to vector<16x1xf32>
    %163 = arith.divf %161, %162 : vector<16x1xf32>
    %164 = vector.broadcast %163 : vector<16x1xf32> to vector<16x128xf32>
    %165 = arith.subf %155, %164 : vector<16x128xf32>
    %166 = arith.mulf %165, %165 : vector<16x128xf32>
    %cst_67 = arith.constant dense<0.000000e+00> : vector<16xf32>
    %167 = vector.multi_reduction <add>, %166, %cst_67 [1] : vector<16x128xf32> to vector<16xf32>
    %168 = vector.shape_cast %167 : vector<16xf32> to vector<16x1xf32>
    %cst_68 = arith.constant 1.280000e+02 : f32
    %169 = vector.broadcast %cst_68 : f32 to vector<16x1xf32>
    %170 = arith.divf %168, %169 : vector<16x1xf32>
    %cst_69 = arith.constant 9.99999974E-6 : f32
    %171 = vector.broadcast %cst_69 : f32 to vector<16x1xf32>
    %172 = arith.addf %170, %171 : vector<16x1xf32>
    %173 = math.rsqrt %172 : vector<16x1xf32>
    %174 = vector.broadcast %173 : vector<16x1xf32> to vector<16x128xf32>
    %175 = arith.mulf %165, %174 : vector<16x128xf32>
    %176 = vector.shape_cast %157 : vector<128xf32> to vector<1x128xf32>
    %177 = vector.broadcast %176 : vector<1x128xf32> to vector<16x128xf32>
    %178 = arith.mulf %175, %177 : vector<16x128xf32>
    %179 = vector.shape_cast %159 : vector<128xf32> to vector<1x128xf32>
    %180 = vector.broadcast %179 : vector<1x128xf32> to vector<16x128xf32>
    %181 = arith.addf %178, %180 : vector<16x128xf32>
    %182 = vector.shape_cast %181 : vector<16x128xf32> to vector<2x8x128xf32>
    %c0_70 = arith.constant 0 : index
    %c0_71 = arith.constant 0 : index
    %c0_72 = arith.constant 0 : index
    %183 = vector.load %arg10[%c0_70, %c0_71, %c0_72] : memref<2x8x128xf32, #tpu.memory_space<vmem>>, vector<2x8x128xf32>
    tpu.vector_store %arg10[%c0_70, %c0_71, %c0_72], %182 {strides = array<i32>} : memref<2x8x128xf32, #tpu.memory_space<vmem>>, vector<2x8x128xf32>,
    return
  }
  func.func @transform_0(%arg0: i32) -> (i32, i32, i32) {
    %c0_i32 = arith.constant 0 : i32
    %c0_i32_0 = arith.constant 0 : i32
    %c0_i32_1 = arith.constant 0 : i32
    return %arg0, %c0_i32, %c0_i32_0 : i32, i32, i32
  }
  func.func @transform_1(%arg0: i32) -> (i32, i32, i32) {
    %c0_i32 = arith.constant 0 : i32
    %c0_i32_0 = arith.constant 0 : i32
    %c0_i32_1 = arith.constant 0 : i32
    return %arg0, %c0_i32, %c0_i32_0 : i32, i32, i32
  }
  func.func @transform_2(%arg0: i32) -> (i32, i32, i32) {
    %c0_i32 = arith.constant 0 : i32
    %c0_i32_0 = arith.constant 0 : i32
    %c0_i32_1 = arith.constant 0 : i32
    return %arg0, %c0_i32, %c0_i32_0 : i32, i32, i32
  }
  func.func @transform_3(%arg0: i32) -> (i32, i32) {
    %c0_i32 = arith.constant 0 : i32
    %c0_i32_0 = arith.constant 0 : i32
    %c0_i32_1 = arith.constant 0 : i32
    return %c0_i32, %c0_i32_0 : i32, i32
  }
  func.func @transform_4(%arg0: i32) -> (i32, i32) {
    %c0_i32 = arith.constant 0 : i32
    %c0_i32_0 = arith.constant 0 : i32
    %c0_i32_1 = arith.constant 0 : i32
    return %c0_i32, %c0_i32_0 : i32, i32
  }
  func.func @transform_5(%arg0: i32) -> (i32, i32) {
    %c0_i32 = arith.constant 0 : i32
    %c0_i32_0 = arith.constant 0 : i32
    %c0_i32_1 = arith.constant 0 : i32
    return %c0_i32, %c0_i32_0 : i32, i32
  }
  func.func @transform_6(%arg0: i32) -> (i32, i32) {
    %c0_i32 = arith.constant 0 : i32
    %c0_i32_0 = arith.constant 0 : i32
    %c0_i32_1 = arith.constant 0 : i32
    return %c0_i32, %c0_i32_0 : i32, i32
  }
  func.func @transform_7(%arg0: i32) -> (i32, i32) {
    %c0_i32 = arith.constant 0 : i32
    %c0_i32_0 = arith.constant 0 : i32
    %c0_i32_1 = arith.constant 0 : i32
    return %c0_i32, %c0_i32_0 : i32, i32
  }
  func.func @transform_8(%arg0: i32) -> (i32, i32) {
    %c0_i32 = arith.constant 0 : i32
    %c0_i32_0 = arith.constant 0 : i32
    %c0_i32_1 = arith.constant 0 : i32
    return %c0_i32, %c0_i32_0 : i32, i32
  }
  func.func @transform_9(%arg0: i32) -> (i32, i32, i32) {
    %c0_i32 = arith.constant 0 : i32
    %c0_i32_0 = arith.constant 0 : i32
    %c0_i32_1 = arith.constant 0 : i32
    return %arg0, %c0_i32, %c0_i32_0 : i32, i32, i32
  }
}

</mosaic_0001>

<bundles_post_ra>
// kernel: tpu_custom_call.1
= control target key start
LH: loop header
LB: loop body
LE: loop exit
PB: predicated region body
PF: predicated region fallthrough
CT: control target
= control target key end

     0   :  { %6 = vsyncpa [#allocation3], 0  ;;  %s481_s0 = inlined_call_operand.hbm [shape: f32[8,128], index: 0, kind: input, shape index: {}]   ;;  %s482_s1 = inlined_call_operand.hbm [shape: f32[16,128], index: 1, kind: output, shape index: {}]  }
   0x1   :  { %7 = vsyncpa [#allocation4], 0 }
   0x2   :  { %9 = vsyncpa [#allocation4 + $0x1], 0  ;;  %s351_s6 = smov 0   ;;  %s353_s7 = smov 0  }
   0x3   :  { %s355_s8 = smov 0   ;;  %s357_s9 = smov 0  }
   0x4 LB: > { %s372_s10 = sadd.s32 4294967295, %s337_s9   ;;  %s183_s11 = sadd.s32 4294967294, %s337_s9   ;;  %s337_s9 = sphi %s357_s9, %s498_s9   ;;  %s333_s8 = sphi %s355_s8, %s497_s8   ;;  %s329_s7 = sphi %s353_s7, %s496_s7   ;;  %s325_s6 = sphi %s351_s6, %s495_s6  }
   0x5   : > { %s376_s12 = sadd.s32 1, %s337_s9   ;;  %s43_s13 = sadd.s32 1, %s333_s8 }
   0x6   : > { %s40_s14 = ssub.s32 %s337_s9, %s376_s12  ;;  %p53_p0 = scmp.ne.s32.totalorder %s333_s8, %s329_s7 }
   0x7   : > { %p41_p1 = scmp.eq.s32.totalorder %s40_s14, 0  ;;  %p54_p2 = scmp.eq.s32.totalorder %s372_s10, 1 }
   0x8   : > { %p59_p3 = scmp.ne.s32.totalorder %s329_s7, %s325_s6  ;;  %p60_p4 = scmp.eq.s32.totalorder %s183_s11, 1 }
   0x9   : > { %s387_s15 = scalar_select %p41_p1, %s333_s8, %s43_s13  }
   0xa   : > { %p389_p5 = por %p54_p2, %p53_p0  ;;  %p393_p6 = por %p60_p4, %p59_p3 }
   0xb   : > { %p184_p7 = scmp.ge.s32.totalorder %s337_s9, 1  ;;  %p67_p8 = scmp.lt.s32.totalorder %s337_s9, 3 }
   0xc   : > { %s486_s16 = scalar_select %p389_p5, 1, 0 }
   0xd   : > { %s487_s17 = scalar_select %p393_p6, 1, 0 }
   0xe   : > { %p483_p9 = scmp.eq.s32.totalorder %s372_s10, 0  ;;  %p400_p10 = pnand %p184_p7, %p67_p8 }
   0xf   : > { %s339_s19 = smov [#allocation2]   ;;  %s243_s24 = scalar_lea.hbm %s481_s0, 128 }
  0x10   : > { %s488_s18 = scalar_select %p400_p10, 1, 0 }
  0x11   : > { %s80_s20 = sshll.u32 %s339_s19, 4  ;;  %p199_p11 = pneg %p400_p10  ;;  %s81_s20 = int_to_ptr.vmem [resolvable:$true] %s80_s20 }
  0x12   : > { %p244_p13 = scmp.ne.s32.totalorder %s481_s0, %s243_s24  ;;  %p250_p3 = scmp.lt.u32.totalorder %s243_s24, %s481_s0 }
  0x13   : > { %p408_p12 = pnand %p483_p9, %p199_p11 }
  0x15   : > { %p245_p0 = pneg %p408_p12 }
  0x17   : > { %p246_p1 = pnand %p245_p0, %p244_p13 }
  0x19   : > { %p247_p2 = pneg %p246_p1 }
  0x1b   : > { %p252_p4 = pnand %p250_p3, %p247_p2 }
  0x1d   : > { %255 = shalt.err (!%p252_p4)
}
  0x1e   : > { %s256_s29 = scalar_lea.vmem %s81_s20, 128  ;;  %p264_p9 = scmp.lt.s32.totalorder %s81_s20, %s81_s20 }
  0x1f   : > { %p257_p7 = scmp.ne.s32.totalorder %s81_s20, %s256_s29  ;;  %p265_p6 = scmp.lt.s32.totalorder %s256_s29, %s256_s29 }
  0x21   : > { %p259_p8 = pnand %p257_p7, %p245_p0  ;;  %p266_p5 = por %p265_p6, %p264_p9 }
  0x23   : > { %p260_p11 = pneg %p259_p8 }
  0x25   : > { %p267_p10 = pnand %p266_p5, %p260_p11 }
  0x27   : > { %270 = shalt.err (!%p267_p10)
}
  0x28   : > { %202 = dma.hbm_to_vmem [thread:$0]  (!%p408_p12), %s481_s0, 128, %s81_s20, [#allocation3]  }
  0x29   : > { %p490_p13 = scmp.ne.s32.totalorder %s488_s18, 0 }
  0x2a   : > { %p491_p1 = scmp.eq.s32.totalorder (!%p490_p13), %s372_s10, 0 }
  0x2b   : > { %93 = sbr.rel (%p490_p13) target bundleno = 77 (0x4d), region = 24 }
  0x32   : > { %316 = dma.done.wait (%p491_p1), [#allocation3], 128   ;;  %p492_p0 = pmov %p491_p1 }
  0x33   : > { %s105_s3 = sand.u32 1, %s329_s7   ;;  %s190_s13 = sshll.u32 %s372_s10, 7  ;;  %v108_v0 = vld [vmem:[#allocation2] sm:$0xff] }
  0x34   : > { %318 = vsyncadd (%p492_p0), [#allocation3], 4294967168  ;;  %s188_s4 = sshll.u32 %s105_s3, 3  ;;  %s441_s18 = scalar_lea.hbm %s482_s1, %s190_s13 }
  0x35   : > { %s107_s5 = scalar_lea.vmem [#allocation5], %s188_s4  ;;  %s111_s20 = scalar_lea.sflag [#allocation4], %s105_s3 }
  0x36   : > { %s124_s11 = sshll.u32 %s107_s5, 4  ;;  %109 = vst [vmem:[%s107_s5] sm:$0xff] %v108_v0  ;;  %p493_p6 = scmp.ne.s32.totalorder %s486_s16, 0  ;;  %s436_s11 = int_to_ptr.vmem [resolvable:$true] %s124_s11 }
  0x37   : > { %s271_s21 = scalar_lea.vmem %s436_s11, 128  ;;  %s340_s22 = smov [#allocation5]  }
  0x38   : > { %p272_p5 = scmp.ne.s32.totalorder %s436_s11, %s271_s21  ;;  %s275_s10 = sshll.u32 %s340_s22, 4  ;;  %s276_s10 = int_to_ptr.vmem [resolvable:$false] %s275_s10 }
  0x39   : > { %s277_s23 = scalar_lea.vmem %s276_s10, 256  ;;  %p278_p12 = scmp.lt.s32.totalorder %s436_s11, %s276_s10 }
  0x3a   : > { %p273_p9 = pnand %p272_p5, %p493_p6  ;;  %p279_p2 = scmp.lt.s32.totalorder %s277_s23, %s271_s21 }
  0x3c   : > { %p274_p10 = pneg %p273_p9  ;;  %p280_p3 = por %p279_p2, %p278_p12 }
  0x3e   : > { %p281_p4 = pnand %p280_p3, %p274_p10 }
  0x40   : > { %284 = shalt.err (!%p281_p4)
}
  0x41   : > { %s285_s24 = scalar_lea.hbm %s441_s18, 128  ;;  %s289_s27 = scalar_lea.hbm %s482_s1, 256 }
  0x42   : > { %p286_p7 = scmp.ne.s32.totalorder %s441_s18, %s285_s24  ;;  %p290_p13 = scmp.lt.u32.totalorder %s441_s18, %s482_s1 }
  0x43   : > { %p291_p1 = scmp.lt.u32.totalorder %s289_s27, %s285_s24  ;;  %p293_p5 = scmp.lt.u32.totalorder %s285_s24, %s441_s18 }
  0x44   : > { %p287_p8 = pnand %p286_p7, %p493_p6 }
  0x45   : > { %p292_p0 = por %p291_p1, %p290_p13 }
  0x46   : > { %p288_p11 = pneg %p287_p8 }
  0x47   : > { %p294_p9 = por %p293_p5, %p292_p0 }
  0x49   : > { %p295_p10 = pnand %p294_p9, %p288_p11 }
  0x4b   : > { %298 = shalt.err (!%p295_p10)
}
  0x4c   : > { %197 = dma.vmem_to_hbm [thread:$0]  (%p493_p6), %s436_s11, 128, %s441_s18, %s111_s20  }
  0x4d PF: > { %p209_p12 = scmp.ge.s32.totalorder %s337_s9, 2  ;;  %s136_s30 = sand.u32 1, %s325_s6  }
  0x4e   : > { %p494_p2 = scmp.ne.s32.totalorder %s487_s17, 0  ;;  %s137_s2 = scalar_lea.sflag [#allocation4], %s136_s30 }
  0x50   : > { %p204_p3 = pnand %p209_p12, %p494_p2 }
  0x52   : > { %320 = dma.done.wait (!%p204_p3), %s137_s2, 128  }
  0x53   : > { %322 = vsyncadd (!%p204_p3), %s137_s2, 4294967168  ;;  %p12_p4 = scmp.ge.s32.totalorder %s376_s12, 4   ;;  %s495_s6 = smov %s329_s7 }
  0x54   : > { %s496_s7 = smov %s333_s8  ;;  %s497_s8 = smov %s387_s15 }
  0x55   : > { %s498_s9 = smov %s376_s12  ;;  %14 = sbr.rel (!%p12_p4) target bundleno = 4 (0x4), region = 61 }
  0x5c   :  { %142 = vsyncpa [#allocation3], 1 }
  0x5d   :  { %144 = vsyncpa [#allocation3 + $0x1], 1 }
  0x5e   :  { %145 = vsyncpa [#allocation4], 1 }
  0x5f   :  { %147 = vsyncpa [#allocation4 + $0x1], 1 }

// kernel: tpu_custom_call.1
= control target key start
LH: loop header
LB: loop body
LE: loop exit
PB: predicated region body
PF: predicated region fallthrough
CT: control target
= control target key end

     0   :  { %s4714_s0 = inlined_call_operand.hbm [shape: f32[4,8,128], index: 0, kind: input, shape index: {}]   ;;  %s4715_s1 = inlined_call_operand.hbm [shape: f32[4,8,128], index: 1, kind: input, shape index: {}]   ;;  %s4716_s2 = inlined_call_operand.hbm [shape: f32[4,8,128], index: 2, kind: input, shape index: {}]   ;;  %s4717_s3 = inlined_call_operand.hbm [shape: f32[128,384], index: 3, kind: input, shape index: {}]   ;;  %s4718_s4 = inlined_call_operand.hbm [shape: f32[128,128], index: 4, kind: input, shape index: {}]   ;;  %s4719_s5 = inlined_call_operand.hbm [shape: f32[128,256], index: 5, kind: input, shape index: {}]   ;;  %s4720_s6 = inlined_call_operand.hbm [shape: f32[256,128], index: 6, kind: input, shape index: {}]   ;;  %s4721_s7 = inlined_call_operand.vmem [shape: f32[9,128], index: 7, kind: input, shape index: {}]   ;;  %s4722_s8 = inlined_call_operand.vmem [shape: f32[1,256], index: 8, kind: input, shape index: {}]   ;;  %s4723_s9 = inlined_call_operand.hbm [shape: f32[4,8,128], index: 9, kind: output, shape index: {}]  }
   0x1   :  { %4745 = sst [smem:[#allocation26_spill]] %s4715_s1 }
   0x2   :  { %4746 = sst [smem:[#allocation27_spill]] %s4717_s3 }
   0x3   :  { %4747 = sst [smem:[#allocation28_spill]] %s4719_s5 }
   0x4   :  { %4748 = sst [smem:[#allocation29_spill]] %s4722_s8 }
   0x5   :  { %4749 = sst [smem:[#allocation30_spill]] %s4723_s9 }
   0x6   :  { %14 = vsyncpa [#allocation3], 0 }
   0x7   :  { %16 = vsyncpa [#allocation3 + $0x1], 0 }
   0x8   :  { %17 = vsyncpa [#allocation6], 0 }
   0x9   :  { %19 = vsyncpa [#allocation6 + $0x1], 0 }
   0xa   :  { %20 = vsyncpa [#allocation9], 0 }
   0xb   :  { %21 = vsyncpa [#allocation12], 0 }
   0xc   :  { %22 = vsyncpa [#allocation4], 0 }
   0xd   :  { %24 = vsyncpa [#allocation4 + $0x1], 0  ;;  %s4088_s30 = smov 0   ;;  %s4090_s10 = smov 0  }
   0xe   :  { %s4092_s11 = smov 0   ;;  %s4094_s12 = smov 0  }
   0xf LB: > { %4750 = sst [smem:[#allocation20_spill]] %s4003_s30  ;;  %s4109_s13 = sadd.s32 4294967295, %s4015_s12   ;;  %s4015_s12 = sphi %s4094_s12, %s4788_s12   ;;  %s4011_s11 = sphi %s4092_s11, %s4792_s11   ;;  %s4007_s10 = sphi %s4090_s10, %s4791_s10   ;;  %s4003_s30 = sphi %s4088_s30, %s4790_s30  }
  0x10   : > { %4751 = sst [smem:[#allocation21_spill]] %s4015_s12  ;;  %s2935_s14 = sadd.s32 4294967294, %s4015_s12  }
  0x11   : > { %p50_p0 = scmp.ne.s32.totalorder %s4007_s10, %s4003_s30  ;;  %p4724_p1 = scmp.eq.s32.totalorder %s4109_s13, 0 }
  0x12   : > { %p258_p3 = scmp.eq.s32.totalorder %s2935_s14, 1  ;;  %p2936_p5 = scmp.ge.s32.totalorder %s4015_s12, 1 }
  0x13   : > { %p4118_p4 = por %p4724_p1, %p50_p0  ;;  %p265_p7 = scmp.lt.s32.totalorder %s4015_s12, 3 }
  0x14   : > { %p4123_p6 = por %p258_p3, %p50_p0  ;;  %s4017_s18 = smov [#allocation8]  }
  0x15   : > { %s4752_s15 = scalar_select %p4118_p4, 1, 0 }
  0x16   : > { %s4753_s16 = scalar_select %p4123_p6, 1, 0 }
  0x17   : > { %p4128_p8 = pnand %p2936_p5, %p265_p7  ;;  %s277_s19 = sshll.u32 %s4017_s18, 4  ;;  %s4132_s19 = int_to_ptr.vmem [resolvable:$true] %s277_s19 }
  0x18   : > { %4754 = sst [smem:[#allocation22_spill]] %s4753_s16  ;;  %s4018_s21 = smov [#allocation11]  }
  0x19   : > { %s4755_s17 = scalar_select %p4128_p8, 1, 0 }
  0x1a   : > { %p3609_p9 = pneg %p4128_p8  ;;  %s303_s22 = sshll.u32 %s4018_s21, 4  ;;  %s4143_s22 = int_to_ptr.vmem [resolvable:$true] %s303_s22 }
  0x1b   : > { %s4757_s3 = sld [smem:[#allocation27_spill]] }
  0x1c   : > { %p4139_p11 = pnand %p3609_p9, %p4724_p1 }
  0x1e   : > { %s4756_s20 = scalar_select %p4139_p11, 1, 0 }
  0x1f   : > { %p4153_p13 = pneg %p4139_p11 }
  0x21   : > { %s3735_s25 = scalar_lea.hbm %s4757_s3, 6144 }
  0x22   : > { %p3736_p12 = scmp.ne.s32.totalorder %s4757_s3, %s3735_s25  ;;  %p3742_p5 = scmp.lt.u32.totalorder %s3735_s25, %s4757_s3 }
  0x23   : > { %s4758_s28 = scalar_select %p4153_p13, 1, 0 }
  0x24   : > { %p3738_p0 = pnand %p4153_p13, %p3736_p12 }
  0x26   : > { %p3739_p3 = pneg %p3738_p0 }
  0x28   : > { %p3744_p7 = pnand %p3742_p5, %p3739_p3 }
  0x2a   : > { %3747 = shalt.err (!%p3744_p7)
}
  0x2b   : > { %s3748_s18 = scalar_lea.vmem %s4132_s19, 6144  ;;  %p3756_p2 = scmp.lt.s32.totalorder %s4132_s19, %s4132_s19 }
  0x2c   : > { %p3749_p9 = scmp.ne.s32.totalorder %s4132_s19, %s3748_s18  ;;  %p3757_p6 = scmp.lt.s32.totalorder %s3748_s18, %s3748_s18 }
  0x2e   : > { %p3751_p10 = pnand %p3749_p9, %p4153_p13  ;;  %p3758_p12 = por %p3757_p6, %p3756_p2 }
  0x30   : > { %p3752_p1 = pneg %p3751_p10 }
  0x32   : > { %p3759_p0 = pnand %p3758_p12, %p3752_p1 }
  0x34   : > { %3762 = shalt.err (!%p3759_p0)
}
  0x35   : > { %s4019_s21 = smov 384   ;;  %s4020_s23 = smov 24  }
  0x36   : > { %3612 = dma.hbm_to_vmem [thread:$0]  (!%p4139_p11), %s4757_s3, 6144, %s4132_s19, [#allocation9], %s4019_s21, %s4019_s21, %s4020_s23  }
  0x37   : > { %s4759_s5 = sld [smem:[#allocation28_spill]] }
  0x3d   : > { %s3763_s29 = scalar_lea.hbm %s4759_s5, 4096 }
  0x3e   : > { %p3764_p2 = scmp.ne.s32.totalorder %s4759_s5, %s3763_s29  ;;  %p3770_p10 = scmp.lt.u32.totalorder %s3763_s29, %s4759_s5 }
  0x40   : > { %p3766_p1 = pnand %p3764_p2, %p4153_p13 }
  0x42   : > { %p3767_p6 = pneg %p3766_p1 }
  0x44   : > { %p3772_p3 = pnand %p3770_p10, %p3767_p6 }
  0x46   : > { %3775 = shalt.err (!%p3772_p3)
}
  0x47   : > { %s3776_s19 = scalar_lea.vmem %s4143_s22, 4096  ;;  %p3784_p12 = scmp.lt.s32.totalorder %s4143_s22, %s4143_s22 }
  0x48   : > { %p3777_p5 = scmp.ne.s32.totalorder %s4143_s22, %s3776_s19  ;;  %p3785_p0 = scmp.lt.s32.totalorder %s3776_s19, %s3776_s19 }
  0x4a   : > { %p3779_p7 = pnand %p3777_p5, %p4153_p13  ;;  %p3786_p2 = por %p3785_p0, %p3784_p12 }
  0x4c   : > { %p3780_p9 = pneg %p3779_p7 }
  0x4e   : > { %p3787_p1 = pnand %p3786_p2, %p3780_p9 }
  0x50   : > { %3790 = shalt.err (!%p3787_p1)
}
  0x51   : > { %s4021_s16 = smov 256   ;;  %s4022_s30 = smov 16  }
  0x52   : > { %3618 = dma.hbm_to_vmem [thread:$0]  (!%p4139_p11), %s4759_s5, 4096, %s4143_s22, [#allocation12], %s4021_s16, %s4021_s16, %s4022_s30  }
  0x53   : > { %s4198_s24 = sadd.s32 1, %s4015_s12   ;;  %s37_s26 = sadd.s32 1, %s4011_s11 }
  0x54   : > { %4760 = sst [smem:[#allocation23_spill]] %s4198_s24  ;;  %s34_s25 = ssub.s32 %s4015_s12, %s4198_s24 }
  0x55   : > { %p35_p6 = scmp.eq.s32.totalorder %s34_s25, 0  ;;  %p44_p10 = scmp.ne.s32.totalorder %s4011_s11, %s4007_s10 }
  0x56   : > { %p45_p3 = scmp.eq.s32.totalorder %s4015_s12, 0  ;;  %p4762_p7 = scmp.eq.s32.totalorder %s4109_s13, 1 }
  0x57   : > { %s4207_s27 = scalar_select %p35_p6, %s4011_s11, %s37_s26  }
  0x58   : > { %p46_p5 = por %p45_p3, %p44_p10  ;;  %p4211_p9 = por %p4762_p7, %p44_p10 }
  0x59   : > { %4761 = sst [smem:[#allocation24_spill]] %s4207_s27  ;;  %p3640_p12 = scmp.lt.s32.totalorder %s4015_s12, 2 }
  0x5a   : > { %s4763_s29 = scalar_select %p4211_p9, 1, 0 }
  0x5b   : > { %s4727_s14 = sand.u32 1, %s4011_s11   ;;  %s4222_s18 = sshll.u32 %s4015_s12, 8 }
  0x5c   : > { %4764 = sst [smem:[#allocation25_spill]] %s4763_s29  ;;  %s4219_s22 = sshll.u32 %s4727_s14, 4 }
  0x5d   : > { %p4224_p0 = pnand %p3640_p12, %p46_p5  ;;  %s357_s16 = sand.u32 1, %s4015_s12  }
  0x5e   : > { %s4766_s1 = sld [smem:[#allocation26_spill]]  ;;  %s361_s25 = scalar_lea.vmem [#allocation5], %s4219_s22 }
  0x5f   : > { %s4765_s19 = scalar_select %p4224_p0, 1, 0 }
  0x60   : > { %s368_s26 = sshll.u32 %s361_s25, 4  ;;  %s4023_s14 = smov [#allocation10]   ;;  %s4236_s26 = int_to_ptr.vmem [resolvable:$true] %s368_s26 }
  0x61   : > { %s4238_s3 = sshll.u32 %s4023_s14, 4  ;;  %s4240_s5 = scalar_lea.sflag [#allocation6], %s357_s16  ;;  %s291_s3 = int_to_ptr.vmem [resolvable:$true] %s4238_s3 }
  0x62   : > { %p4246_p1 = pneg %p4224_p0 }
  0x64   : > { %s4233_s23 = scalar_lea.hbm %s4766_s1, %s4222_s18  ;;  %s3796_s24 = scalar_lea.hbm %s4766_s1, 512 }
  0x65   : > { %s3791_s27 = scalar_lea.hbm %s4233_s23, 256  ;;  %p3797_p3 = scmp.lt.u32.totalorder %s4233_s23, %s4766_s1 }
  0x66   : > { %p3792_p2 = scmp.ne.s32.totalorder %s4233_s23, %s3791_s27  ;;  %p3798_p5 = scmp.lt.u32.totalorder %s3796_s24, %s3791_s27 }
  0x67   : > { %s4767_s30 = scalar_select %p4246_p1, 1, 0 }
  0x68   : > { %p3794_p6 = pnand %p4246_p1, %p3792_p2  ;;  %p3799_p7 = por %p3798_p5, %p3797_p3 }
  0x69   : > { %p3800_p12 = scmp.lt.u32.totalorder %s3791_s27, %s4233_s23 }
  0x6a   : > { %p3795_p10 = pneg %p3794_p6 }
  0x6b   : > { %p3801_p9 = por %p3800_p12, %p3799_p7 }
  0x6d   : > { %p3802_p4 = pnand %p3801_p9, %p3795_p10 }
  0x6f   : > { %3805 = shalt.err (!%p3802_p4)
}
  0x70   : > { %s3806_s16 = scalar_lea.vmem %s4236_s26, 256  ;;  %s4024_s21 = smov [#allocation5]  }
  0x71   : > { %p3807_p2 = scmp.ne.s32.totalorder %s4236_s26, %s3806_s16  ;;  %s3811_s25 = sshll.u32 %s4024_s21, 4  ;;  %s3812_s25 = int_to_ptr.vmem [resolvable:$false] %s3811_s25 }
  0x72   : > { %s3813_s12 = scalar_lea.vmem %s3812_s25, 512  ;;  %p3814_p11 = scmp.lt.s32.totalorder %s4236_s26, %s3812_s25 }
  0x73   : > { %p3809_p6 = pnand %p3807_p2, %p4246_p1  ;;  %p3815_p13 = scmp.lt.s32.totalorder %s3813_s12, %s3806_s16 }
  0x75   : > { %p3810_p8 = pneg %p3809_p6  ;;  %p3816_p3 = por %p3815_p13, %p3814_p11 }
  0x77   : > { %p3817_p5 = pnand %p3816_p3, %p3810_p8 }
  0x79   : > { %3820 = shalt.err (!%p3817_p5)
}
  0x7a   : > { %s4025_s24 = smov 128   ;;  %s4026_s27 = smov 8  }
  0x7b   : > { %3628 = dma.hbm_to_vmem [thread:$0]  (!%p4224_p0), %s4233_s23, 256, %s4236_s26, %s4240_s5, %s4025_s24, %s4025_s24, %s4026_s27  }
  0x7c   : > { %s3821_s16 = scalar_lea.hbm %s4718_s4, 2048  ;;  %p4768_p8 = scmp.ne.s32.totalorder %s4758_s28, 0 }
  0x7d   : > { %p3822_p4 = scmp.ne.s32.totalorder %s4718_s4, %s3821_s16  ;;  %p3828_p9 = scmp.lt.u32.totalorder %s3821_s16, %s4718_s4 }
  0x7f   : > { %p3824_p11 = pnand %p3822_p4, %p4768_p8 }
  0x81   : > { %p3825_p13 = pneg %p3824_p11 }
  0x83   : > { %p3830_p10 = pnand %p3828_p9, %p3825_p13 }
  0x85   : > { %3833 = shalt.err (!%p3830_p10)
}
  0x86   : > { %s3834_s29 = scalar_lea.vmem %s291_s3, 2048  ;;  %p3842_p6 = scmp.lt.s32.totalorder %s291_s3, %s291_s3 }
  0x87   : > { %p3835_p7 = scmp.ne.s32.totalorder %s291_s3, %s3834_s29  ;;  %p3843_p3 = scmp.lt.s32.totalorder %s3834_s29, %s3834_s29 }
  0x89   : > { %p3837_p12 = pnand %p3835_p7, %p4768_p8  ;;  %p3844_p5 = por %p3843_p3, %p3842_p6 }
  0x8b   : > { %p3838_p2 = pneg %p3837_p12 }
  0x8d   : > { %p3845_p0 = pnand %p3844_p5, %p3838_p2 }
  0x8f   : > { %3848 = shalt.err (!%p3845_p0)
}
  0x90   : > { %p4769_p4 = scmp.ne.s32.totalorder %s4756_s20, 0  ;;  %s4027_s23 = smov [#allocation13]  }
  0x91   : > { %s316_s26 = sshll.u32 %s4027_s23, 4  ;;  %s3849_s29 = scalar_lea.hbm %s4720_s6, 4096  ;;  %s317_s26 = int_to_ptr.vmem [resolvable:$true] %s316_s26 }
  0x92   : > { %3615 = dma.hbm_to_vmem [thread:$0]  (!%p4769_p4), %s4718_s4, 2048, %s291_s3, [#allocation9], %s4025_s24, %s4025_s24, %s4026_s27  }
  0x93   : > { %p3850_p0 = scmp.ne.s32.totalorder %s4720_s6, %s3849_s29  ;;  %p3856_p9 = scmp.lt.u32.totalorder %s3849_s29, %s4720_s6 }
  0x95   : > { %p3852_p11 = pnand %p3850_p0, %p4768_p8 }
  0x97   : > { %p3853_p13 = pneg %p3852_p11 }
  0x99   : > { %p3858_p10 = pnand %p3856_p9, %p3853_p13 }
  0x9b   : > { %3861 = shalt.err (!%p3858_p10)
}
  0x9c   : > { %s3862_s3 = scalar_lea.vmem %s317_s26, 4096  ;;  %p3870_p6 = scmp.lt.s32.totalorder %s317_s26, %s317_s26 }
  0x9d   : > { %p3863_p7 = scmp.ne.s32.totalorder %s317_s26, %s3862_s3  ;;  %p3871_p3 = scmp.lt.s32.totalorder %s3862_s3, %s3862_s3 }
  0x9f   : > { %p3865_p12 = pnand %p3863_p7, %p4768_p8  ;;  %p3872_p5 = por %p3871_p3, %p3870_p6 }
  0xa1   : > { %p3866_p2 = pneg %p3865_p12 }
  0xa3   : > { %p3873_p1 = pnand %p3872_p5, %p3866_p2 }
  0xa5   : > { %3876 = shalt.err (!%p3873_p1)
}
  0xa6   : > { %3621 = dma.hbm_to_vmem [thread:$0]  (!%p4769_p4), %s4720_s6, 4096, %s317_s26, [#allocation12], %s4025_s24, %s4025_s24, %s4026_s27  }
  0xa7   : > { %s4320_s23 = scalar_lea.hbm %s4714_s0, %s4222_s18  ;;  %s340_s20 = scalar_lea.vmem [#allocation2], %s4219_s22 }
  0xa8   : > { %s347_s14 = sshll.u32 %s340_s20, 4  ;;  %s4770_s21 = sand.u32 1, %s4011_s11   ;;  %s4323_s14 = int_to_ptr.vmem [resolvable:$true] %s347_s14 }
  0xa9   : > { %s4327_s29 = scalar_lea.sflag [#allocation3], %s4770_s21  ;;  %s3877_s16 = scalar_lea.hbm %s4320_s23, 256 }
  0xaa   : > { %p3878_p1 = scmp.ne.s32.totalorder %s4320_s23, %s3877_s16  ;;  %p4771_p8 = scmp.ne.s32.totalorder %s4767_s30, 0 }
  0xab   : > { %s3882_s12 = scalar_lea.hbm %s4714_s0, 512  ;;  %p3883_p11 = scmp.lt.u32.totalorder %s4320_s23, %s4714_s0 }
  0xac   : > { %p3880_p4 = pnand %p3878_p1, %p4771_p8  ;;  %p3884_p13 = scmp.lt.u32.totalorder %s3882_s12, %s3877_s16 }
  0xad   : > { %p3886_p10 = scmp.lt.u32.totalorder %s3877_s16, %s4320_s23 }
  0xae   : > { %p3881_p0 = pneg %p3880_p4  ;;  %p3885_p9 = por %p3884_p13, %p3883_p11 }
  0xb0   : > { %p3887_p7 = por %p3886_p10, %p3885_p9 }
  0xb2   : > { %p3888_p12 = pnand %p3887_p7, %p3881_p0 }
  0xb4   : > { %3891 = shalt.err (!%p3888_p12)
}
  0xb5   : > { %s3892_s1 = scalar_lea.vmem %s4323_s14, 256  ;;  %s4028_s28 = smov [#allocation2]  }
  0xb6   : > { %p3893_p2 = scmp.ne.s32.totalorder %s4323_s14, %s3892_s1  ;;  %s3897_s9 = sshll.u32 %s4028_s28, 4  ;;  %s3898_s9 = int_to_ptr.vmem [resolvable:$false] %s3897_s9 }
  0xb7   : > { %s3899_s20 = scalar_lea.vmem %s3898_s9, 512  ;;  %p3900_p5 = scmp.lt.s32.totalorder %s4323_s14, %s3898_s9 }
  0xb8   : > { %p3895_p6 = pnand %p3893_p2, %p4771_p8  ;;  %p3901_p1 = scmp.lt.s32.totalorder %s3899_s20, %s3892_s1 }
  0xba   : > { %p3896_p3 = pneg %p3895_p6  ;;  %p3902_p4 = por %p3901_p1, %p3900_p5 }
  0xbc   : > { %p3903_p11 = pnand %p3902_p4, %p3896_p3 }
  0xbe   : > { %3906 = shalt.err (!%p3903_p11)
}
  0xbf   : > { %p4772_p0 = scmp.ne.s32.totalorder %s4765_s19, 0  ;;  %s4358_s26 = scalar_lea.hbm %s4716_s2, %s4222_s18 }
  0xc0   : > { %s382_s25 = scalar_lea.vmem [#allocation7], %s4219_s22  ;;  %s3907_s3 = scalar_lea.hbm %s4358_s26, 256 }
  0xc1   : > { %3625 = dma.hbm_to_vmem [thread:$0]  (!%p4772_p0), %s4320_s23, 256, %s4323_s14, %s4327_s29, %s4025_s24, %s4025_s24, %s4026_s27  }
  0xc2   : > { %s389_s12 = sshll.u32 %s382_s25, 4  ;;  %p3908_p13 = scmp.ne.s32.totalorder %s4358_s26, %s3907_s3  ;;  %s4361_s12 = int_to_ptr.vmem [resolvable:$true] %s389_s12 }
  0xc3   : > { %s3912_s14 = scalar_lea.hbm %s4716_s2, 512  ;;  %p3913_p7 = scmp.lt.u32.totalorder %s4358_s26, %s4716_s2 }
  0xc4   : > { %p3910_p9 = pnand %p3908_p13, %p4771_p8  ;;  %p3914_p12 = scmp.lt.u32.totalorder %s3912_s14, %s3907_s3 }
  0xc5   : > { %p3916_p6 = scmp.lt.u32.totalorder %s3907_s3, %s4358_s26 }
  0xc6   : > { %p3911_p10 = pneg %p3910_p9  ;;  %p3915_p2 = por %p3914_p12, %p3913_p7 }
  0xc8   : > { %p3917_p3 = por %p3916_p6, %p3915_p2 }
  0xca   : > { %p3918_p5 = pnand %p3917_p3, %p3911_p10 }
  0xcc   : > { %3921 = shalt.err (!%p3918_p5)
}
  0xcd   : > { %s3922_s22 = scalar_lea.vmem %s4361_s12, 256  ;;  %s4029_s1 = smov [#allocation7]  }
  0xce   : > { %p3923_p1 = scmp.ne.s32.totalorder %s4361_s12, %s3922_s22  ;;  %s3927_s28 = sshll.u32 %s4029_s1, 4  ;;  %s3928_s28 = int_to_ptr.vmem [resolvable:$false] %s3927_s28 }
  0xcf   : > { %s3929_s9 = scalar_lea.vmem %s3928_s28, 512  ;;  %p3930_p13 = scmp.lt.s32.totalorder %s4361_s12, %s3928_s28 }
  0xd0   : > { %p3925_p4 = pnand %p3923_p1, %p4771_p8  ;;  %p3931_p9 = scmp.lt.s32.totalorder %s3929_s9, %s3922_s22 }
  0xd2   : > { %p3926_p11 = pneg %p3925_p4  ;;  %p3932_p7 = por %p3931_p9, %p3930_p13 }
  0xd4   : > { %p3933_p12 = pnand %p3932_p7, %p3926_p11 }
  0xd6   : > { %3936 = shalt.err (!%p3933_p12)
}
  0xd7   : > { %3631 = dma.hbm_to_vmem [thread:$0]  (!%p4772_p0), %s4358_s26, 256, %s4361_s12, %s4240_s5, %s4025_s24, %s4025_s24, %s4026_s27  }
  0xd8   : > { %p4773_p8 = scmp.ne.s32.totalorder %s4755_s17, 0 }
  0xd9   : > { %s4391_s30 = sand.u32 (!%p4773_p8), 1, %s4007_s10   ;;  %p4774_p10 = scmp.ne.s32.totalorder (!%p4773_p8), %s4752_s15, 0 }
  0xda   : > { %401 = sbr.rel (%p4773_p8) target bundleno = 3515 (0xdbb), region = 56  ;;  %s4394_s20 = sshll.u32 (!%p4773_p8), %s4391_s30, 4 }
  0xdb   : > { %s404_s19 = scalar_lea.sflag (!%p4773_p8), [#allocation3], %s4391_s30  ;;  %s407_s21 = scalar_lea.vmem (!%p4773_p8), [#allocation2], %s4394_s20 }
  0xe1   : > { %3982 = dma.done.wait (%p4774_p10), %s404_s19, 256  }
  0xe2   : > { %3984 = vsyncadd (%p4774_p10), %s404_s19, 4294967040  ;;  %s412_s5 = sand.u32 1, %s4109_s13   ;;  %s416_s24 = scalar_lea.vmem [#allocation5], %s4394_s20 }
  0xe3   : > { %s413_s17 = scalar_lea.sflag [#allocation6], %s412_s5 }
  0xe4   : > { %3986 = dma.done.wait (%p4774_p10), %s413_s17, 512  }
  0xe5   : > { %3988 = vsyncadd (%p4774_p10), %s413_s17, 4294966784  ;;  %s425_s27 = scalar_lea.vmem [#allocation7], %s4394_s20  ;;  %p4775_p0 = scmp.eq.s32.totalorder %s4109_s13, 0 }
  0xe7   : > { %3990 = dma.done.wait (%p4775_p0), [#allocation9], 8192   ;;  %p4776_p2 = pmov %p4775_p0 }
  0xe8   : > { %p4777_p6 = pmov %p4775_p0 }
  0xe9   : > { %3992 = vsyncadd (%p4776_p2), [#allocation9], 4294959104 }
  0xea   : > { %3994 = dma.done.wait (%p4777_p6), [#allocation12], 8192   ;;  %p4778_p3 = pmov %p4775_p0 }
  0xeb   : > { %v495_v0 = vld [vmem:[#allocation8] sm:$0xff]  ;;  %v496_v1 = vld [vmem:[#allocation8 + $0x18] sm:$0xff]  ;;  %v592_v2 = vld [vmem:[#allocation8 + $0x8] sm:$0xff]  ;;  %v4030_v52 = vmov 0.0   ;;  %vm4031_vm0 = vmmov 0   ;;  %vm786_vm1 = vcmask 261120  }
  0xec   : > { %3996 = vsyncadd (%p4778_p3), [#allocation12], 4294959104  ;;  %v3387_v3 = vpack.c.bf16 %v496_v1, %v495_v0  ;;  %v593_v4 = vld [vmem:[#allocation8 + $0x20] sm:$0xff]  ;;  %v497_v5 = vld [vmem:[#allocation8 + $0x30] sm:$0xff]  ;;  %s4032_s12 = smov 96   ;;  %vm939_vm2 = vcmask 64512  }
  0xed   : > { %v498_v6 = vld [vmem:[#allocation8 + $0x48] sm:$0xff]  ;;  %v3419_v7 = vpack.c.bf16 %v593_v4, %v592_v2  ;;  %v594_v9 = vld [vmem:[#allocation8 + $0x38] sm:$0xff]  ;;  %v595_v10 = vld [vmem:[#allocation8 + $0x50] sm:$0xff]  ;;  %s4033_s23 = smov 64   ;;  %s4034_s14 = smov 32  }
  0xee   : > { %v3391_v8 = vpack.c.bf16 %v498_v6, %v497_v5  ;;  %v499_v11 = vld [vmem:[#allocation8 + $0x60] sm:$0xff]  ;;  %3388 = vmatprep.subr.bf16.mxu0 %v3387_v3  ;;  %v3423_v12 = vpack.c.bf16 %v595_v10, %v594_v9  ;;  %v500_v13 = vld [vmem:[#allocation8 + $0x78] sm:$0xff]  ;;  %v596_v14 = vld [vmem:[#allocation8 + $0x68] sm:$0xff]  ;;  %s4779_s5 = sld [smem:[#allocation29_spill]]  ;;  %s4780_s25 = sld [smem:[#allocation25_spill]] }
  0xef   : > { %v597_v15 = vld [vmem:[#allocation8 + $0x80] sm:$0xff]  ;;  %3420 = vmatprep.subr.bf16.mxu1 %v3419_v7  ;;  %3390 = vmatpush3.bf16.msra.mxu0 %v3387_v3  ;;  %v3395_v16 = vpack.c.bf16 %v500_v13, %v499_v11  ;;  %v501_v18 = vld [vmem:[#allocation8 + $0x90] sm:$0xff]  ;;  %v502_v19 = vld [vmem:[#allocation8 + $0xa8] sm:$0xff]  ;;  %s485_s3 = scalar_lea.vmem [#allocation14], %s4394_s20  ;;  %s4781_s29 = sld [smem:[#allocation30_spill]] }
  0xf0   : > { %3422 = vmatpush3.bf16.msra.mxu1 %v3419_v7  ;;  %3392 = vmatprep.subr.bf16.mxu0 %v3391_v8  ;;  %v3427_v17 = vpack.c.bf16 %v597_v15, %v596_v14  ;;  %v598_v20 = vld [vmem:[#allocation8 + $0x98] sm:$0xff]  ;;  %v599_v21 = vld [vmem:[#allocation8 + $0xb0] sm:$0xff]  ;;  %v3399_v22 = vpack.c.bf16 %v502_v19, %v501_v18  ;;  %v503_v24 = vld [vmem:[#allocation8 + $0xc0] sm:$0xff]  ;;  %s2781_s8 = sshll.u32 %s485_s3, 4  ;;  %s2768_s22 = scalar_lea.sflag [#allocation4], %s4391_s30  ;;  %s4670_s8 = int_to_ptr.vmem [resolvable:$true] %s2781_s8 }
  0xf1   : > { %3424 = vmatprep.subr.bf16.mxu1 %v3423_v12  ;;  %v3431_v23 = vpack.c.bf16 %v599_v21, %v598_v20  ;;  %v504_v25 = vld [vmem:[#allocation8 + $0xd8] sm:$0xff]  ;;  %v4419_v26 = vld [vmem:[%s407_s21] sm:$0xff]  ;;  %v600_v27 = vld [vmem:[#allocation8 + $0xc8] sm:$0xff]  ;;  %s3937_s1 = scalar_lea.vmem %s4670_s8, 256 }
  0xf2   : > { %v601_v28 = vld [vmem:[#allocation8 + $0xe0] sm:$0xff]  ;;  %3190 = vmatprep.mubr.f32.mxu0 %v4419_v26  ;;  %v3403_v30 = vpack.c.bf16 %v504_v25, %v503_v24  ;;  %v505_v32 = vld [vmem:[#allocation8 + $0xf0] sm:$0xff]  ;;  %v506_v33 = vld [vmem:[#allocation8 + $0x108] sm:$0xff]  ;;  %p3938_p5 = scmp.ne.s32.totalorder %s4670_s8, %s3937_s1 }
  0xf3   : > { %3394 = vmatpush3.bf16.msra.mxu0 %v3391_v8  ;;  %v590_v29 = vld [vmem:[%s416_s24] sm:$0xff]  ;;  %v3435_v31 = vpack.c.bf16 %v601_v28, %v600_v27  ;;  %v602_v34 = vld [vmem:[#allocation8 + $0xf8] sm:$0xff]  ;;  %v3407_v36 = vpack.c.bf16 %v506_v33, %v505_v32  ;;  %v604_v40 = vld [vmem:[#allocation8 + $0x128] sm:$0xff] }
  0xf4   : > { %3426 = vmatpush3.bf16.msra.mxu1 %v3423_v12  ;;  %3396 = vmatprep.subr.bf16.mxu0 %v3395_v16  ;;  %v603_v35 = vld [vmem:[#allocation8 + $0x110] sm:$0xff]  ;;  %v507_v38 = vld [vmem:[#allocation8 + $0x120] sm:$0xff]  ;;  %v508_v39 = vld [vmem:[#allocation8 + $0x138] sm:$0xff]  ;;  %p4782_p1 = scmp.ne.s32.totalorder %s4780_s25, 0 }
  0xf5   : > { %3428 = vmatprep.subr.bf16.mxu1 %v3427_v17  ;;  %3225 = vmatprep.mubr.f32.mxu1 %v590_v29  ;;  %v3439_v37 = vpack.c.bf16 %v603_v35, %v602_v34  ;;  %v605_v41 = vld [vmem:[#allocation8 + $0x140] sm:$0xff]  ;;  %v3411_v42 = vpack.c.bf16 %v508_v39, %v507_v38  ;;  %v509_v44 = vld [vmem:[#allocation8 + $0x150] sm:$0xff]  ;;  %v510_v45 = vld [vmem:[#allocation8 + $0x168] sm:$0xff] }
  0xf6   : > { %v3443_v43 = vpack.c.bf16 %v605_v41, %v604_v40  ;;  %v606_v46 = vld [vmem:[#allocation8 + $0x158] sm:$0xff]  ;;  %v607_v47 = vld [vmem:[#allocation8 + $0x170] sm:$0xff]  ;;  %v3415_v48 = vpack.c.bf16 %v510_v45, %v509_v44  ;;  %v690_v54 = vld [vmem:[#allocation8 + $0x28] sm:$0xff]  ;;  %p3939_p4 = pnand %p3938_p5, %p4782_p1 }
  0xf7   : > { %3398 = vmatpush3.bf16.msra.mxu0 %v3395_v16  ;;  %v3447_v49 = vpack.c.bf16 %v607_v47, %v606_v46  ;;  %v4426_v50 = vld [vmem:[%s407_s21 + $0x8] sm:$0xff]  ;;  %v689_v53 = vld [vmem:[#allocation8 + $0x10] sm:$0xff]  ;;  %v2960_v56 = vld [vmem:[%s4721_s7] ss:$0 sm:$0xff] }
  0xf8   : > { %3430 = vmatpush3.bf16.msra.mxu1 %v3427_v17  ;;  %3400 = vmatprep.subr.bf16.mxu0 %v3399_v22  ;;  %v591_v51 = vld [vmem:[%s416_s24 + $0x8] sm:$0xff]  ;;  %v3451_v55 = vpack.c.bf16 %v690_v54, %v689_v53  ;;  %v691_v57 = vld [vmem:[#allocation8 + $0x40] sm:$0xff]  ;;  %v693_v59 = vld [vmem:[#allocation8 + $0x70] sm:$0xff]  ;;  %p3940_p11 = pneg %p3939_p4 }
  0xf9   : > { %3432 = vmatprep.subr.bf16.mxu1 %v3431_v23  ;;  %v692_v58 = vld [vmem:[#allocation8 + $0x58] sm:$0xff]  ;;  %v2961_v61 = vld [vmem:[%s4721_s7 + $0x1] ss:$0 sm:$0xff]  ;;  %v694_v63 = vld [vmem:[#allocation8 + $0x88] sm:$0xff] }
  0xfa   : > { %v3455_v62 = vpack.c.bf16 %v692_v58, %v691_v57  ;;  %v3459_v2 = vpack.c.bf16 %v694_v63, %v693_v59  ;;  %v695_v3 = vld [vmem:[#allocation8 + $0xa0] sm:$0xff]  ;;  %v696_v4 = vld [vmem:[#allocation8 + $0xb8] sm:$0xff]  ;;  %v697_v11 = vld [vmem:[#allocation8 + $0xd0] sm:$0xff] }
  0xfb   : > { %3402 = vmatpush3.bf16.msra.mxu0 %v3399_v22  ;;  %v687_v8 = vld [vmem:[%s425_s27] sm:$0xff]  ;;  %v3463_v10 = vpack.c.bf16 %v696_v4, %v695_v3  ;;  %v698_v12 = vld [vmem:[#allocation8 + $0xe8] sm:$0xff]  ;;  %v700_v17 = vld [vmem:[#allocation8 + $0x118] sm:$0xff] }
  0xfc   : > { %3434 = vmatpush3.bf16.msra.mxu1 %v3431_v23  ;;  %3404 = vmatprep.subr.bf16.mxu0 %v3403_v30  ;;  %v3467_v15 = vpack.c.bf16 %v698_v12, %v697_v11  ;;  %v699_v16 = vld [vmem:[#allocation8 + $0x100] sm:$0xff]  ;;  %v701_v20 = vld [vmem:[#allocation8 + $0x130] sm:$0xff]  ;;  %v702_v21 = vld [vmem:[#allocation8 + $0x148] sm:$0xff] }
  0xfd   : > { %3436 = vmatprep.subr.bf16.mxu1 %v3435_v31  ;;  %v3471_v19 = vpack.c.bf16 %v700_v17, %v699_v16  ;;  %v3475_v22 = vpack.c.bf16 %v702_v21, %v701_v20  ;;  %v703_v23 = vld [vmem:[#allocation8 + $0x160] sm:$0xff]  ;;  %v704_v24 = vld [vmem:[#allocation8 + $0x178] sm:$0xff] }
  0xfe   : > { %v3479_v25 = vpack.c.bf16 %v704_v24, %v703_v23  ;;  %v688_v27 = vld [vmem:[%s425_s27 + $0x8] sm:$0xff]  ;;  %v2962_v35 = vld [vmem:[%s4721_s7 + $0x2] ss:$0 sm:$0xff] }
  0xff   : > { %3406 = vmatpush3.bf16.msra.mxu0 %v3403_v30 }
 0x100   : > { %3438 = vmatpush3.bf16.msra.mxu1 %v3435_v31  ;;  %3408 = vmatprep.subr.bf16.mxu0 %v3407_v36 }
 0x101   : > { %3440 = vmatprep.subr.bf16.mxu1 %v3439_v37 }
 0x103   : > { %3410 = vmatpush3.bf16.msra.mxu0 %v3407_v36 }
 0x104   : > { %3442 = vmatpush3.bf16.msra.mxu1 %v3439_v37  ;;  %3412 = vmatprep.subr.bf16.mxu0 %v3411_v42 }
 0x105   : > { %3444 = vmatprep.subr.bf16.mxu1 %v3443_v43 }
 0x107   : > { %3414 = vmatpush3.bf16.msra.mxu0 %v3411_v42 }
 0x108   : > { %3446 = vmatpush3.bf16.msra.mxu1 %v3443_v43  ;;  %3416 = vmatprep.subr.bf16.mxu0 %v3415_v48 }
 0x109   : > { %3448 = vmatprep.subr.bf16.mxu1 %v3447_v49 }
 0x10b   : > { %3418 = vmatpush3.bf16.msra.mxu0 %v3415_v48 }
 0x10c   : > { %3450 = vmatpush3.bf16.msra.mxu1 %v3447_v49  ;;  %3452 = vmatprep.subr.bf16.mxu0 %v3451_v55 }
 0x10d   : > { %3263 = vmatprep.subr.mxu1 %v4030_v52 }
 0x10e   : > { %3191 = vmatmul.mubr.f32.vlgmr.msra.gmra.mrb[0].mxu0 %v4426_v50 }
 0x10f   : > { %3226 = vmatmul.mubr.f32.vlgmr.msra.gmra.mrb[0].mxu1 %v591_v51  ;;  %3454 = vmatpush3.bf16.msra.mxu0 %v3451_v55 }
 0x110   : > { %3265 = vmatprep.mubr.msk.f32.mxu1 %vm4031_vm0, %v4030_v52  ;;  %3456 = vmatprep.subr.bf16.mxu0 %v3455_v62 }
 0x111   : > { %3260 = vmatprep.mubr.f32.mxu0 %v687_v8 }
 0x113   : > { %3458 = vmatpush3.bf16.msra.mxu0 %v3455_v62 }
 0x114   : > { %3460 = vmatprep.subr.bf16.mxu0 %v3459_v2 }
 0x117   : > { %3462 = vmatpush3.bf16.msra.mxu0 %v3459_v2 }
 0x118   : > { %3464 = vmatprep.subr.bf16.mxu0 %v3463_v10 }
 0x11b   : > { %3466 = vmatpush3.bf16.msra.mxu0 %v3463_v10 }
 0x11c   : > { %3468 = vmatprep.subr.bf16.mxu0 %v3467_v15 }
 0x11f   : > { %3470 = vmatpush3.bf16.msra.mxu0 %v3467_v15 }
 0x120   : > { %3472 = vmatprep.subr.bf16.mxu0 %v3471_v19 }
 0x123   : > { %3474 = vmatpush3.bf16.msra.mxu0 %v3471_v19 }
 0x124   : > { %3476 = vmatprep.subr.bf16.mxu0 %v3475_v22 }
 0x127   : > { %3478 = vmatpush3.bf16.msra.mxu0 %v3475_v22 }
 0x128   : > { %3480 = vmatprep.subr.bf16.mxu0 %v3479_v25 }
 0x12b   : > { %3482 = vmatpush3.bf16.msra.mxu0 %v3479_v25 }
 0x12e   : > { %3261 = vmatmul.mubr.f32.vlgmr.msra.gmra.mrb[2].mxu0 %v688_v27 }
 0x1e1   : > { %v3192_v60 = vpop.f32.mrb[0].mxu0 }
 0x1e2   : > { %v3227_v0 = vpop.f32.mrb[0].mxu1  ;;  %v581_v1 = vpop.f32.mrb[1].mxu0  ;;  %v587_v13 = vadd.f32 %v3192_v60, %v2960_v56 }
 0x1e3   : > { %v582_v5 = vadd.f32 %v2960_v56, %v581_v1  ;;  %v678_v6 = vpop.f32.mrb[1].mxu1  ;;  %v4451_v14 = vadd.f32 %v3227_v0, %v2961_v61 }
 0x1e4   : > { %v4440_v7 = vadd.f32 %v2961_v61, %v678_v6  ;;  %v4459_v18 = vmul.f32 0.17677669, %v587_v13 }
 0x1e5   : > { %v4444_v9 = vmul.f32 0.17677669, %v582_v5 }
 0x1e6   : > { %1114 = vrot.lane.b32.xlu1 %v4440_v7, %s4032_s12  ;;  %3264 = vmatpush3.xpose.msk.msra.mxu1 %vm786_vm1, %v4440_v7 }
 0x1e7   : > { %3268 = vmatprep.subr.mxu1 %v4030_v52 }
 0x1e9   : > { %3266 = vmatmul.mubr.msk.f32.vlgmr.msra.gmra.mrb[2].mxu1 %vm786_vm1, %v4444_v9 }
 0x1ea   : > { %1112 = vrot.lane.b32.xlu1 %v4444_v9, %s4032_s12  ;;  %3269 = vmatpush3.xpose.msk.msra.mxu1 %vm786_vm1, %v4451_v14 }
 0x1eb   : > { %3270 = vmatprep.mubr.msk.f32.mxu1 %vm4031_vm0, %v4030_v52  ;;  %3273 = vmatprep.subr.mxu1 %v4030_v52 }
 0x1ed   : > { %3271 = vmatmul.mubr.msk.f32.vlgmr.msra.gmra.mrb[4].mxu1 %vm786_vm1, %v4459_v18 }
 0x1ee   : > { %1190 = vrot.lane.b32.xlu1 %v4459_v18, %s4032_s12  ;;  %3275 = vmatprep.mubr.msk.f32.mxu1 %vm4031_vm0, %v4030_v52 }
 0x201   : > { %v3262_v34 = vpop.f32.mrb[2].mxu0 }
 0x202   : > { %v4477_v36 = vadd.f32 %v3262_v34, %v2962_v35  ;;  %v775_v37 = vpop.f32.mrb[3].mxu0 }
 0x203   : > { %v4479_v38 = vadd.f32 %v2962_v35, %v775_v37 }
 0x205   : > { %1287 = vrot.lane.b32.xlu1 %v4479_v38, %s4032_s12  ;;  %3274 = vmatpush3.msra.mxu1 %v4479_v38 }
 0x206   : > { %3278 = vmatprep.subr.mxu1 %v4030_v52 }
 0x258   : > { %v1115_v45 = vpop.permute.xlu1 %1114 }
 0x25c   : > { %v1113_v48 = vpop.permute.xlu1 %1112 }
 0x260   : > { %v1191_v49 = vpop.permute.xlu1 %1190 }
 0x277   : > { %v1288_v53 = vpop.permute.xlu1 %1287 }
 0x2bc   : > { %v859_v28 = vpop.f32.mrb[2].mxu1 }
 0x2bd   : > { %v3267_v29 = vpop.f32.mrb[3].mxu1  ;;  %v940_v30 = vsel %vm939_vm2, %v859_v28, -inf }
 0x2be   : > { %941 = vmax.xlane.f32.xlu0 %v940_v30 }
 0x2c0   : > { %v935_v31 = vpop.f32.mrb[4].mxu1 }
 0x2c1   : > { %v3272_v32 = vpop.f32.mrb[5].mxu1  ;;  %v943_v33 = vsel %vm939_vm2, %v935_v31, -inf }
 0x2c2   : > { %944 = vmax.xlane.f32.xlu0 %v943_v33 }
 0x2d8   : > { %1192 = vrot.lane.b32.xlu0 %v4451_v14, %s4032_s12 }
 0x34b   : > { %v942_v39 = vpop.xlane.xlu0 %941 }
 0x34c   : > { %v946_v40 = vsub.f32 %v859_v28, %v942_v39 }
 0x34e   : > { %v948_v41 = vmul.f32 1.442695, %v946_v40 }
 0x34f   : > { %v945_v42 = vpop.xlane.xlu0 %944 }
 0x350   : > { %3695 = vpow2.f32 %v948_v41  ;;  %v947_v43 = vsub.f32 %v935_v31, %v945_v42 }
 0x352   : > { %v950_v44 = vmul.f32 1.442695, %v947_v43 }
 0x353   : > { %v1193_v51 = vpop.permute.xlu0 %1192 }
 0x354   : > { %3697 = vpow2.f32 %v950_v44 }
 0x35a   : > { %v4487_v46 = vpop.eup %3695 }
 0x35b   : > { %3276 = vmatmul.mubr.msk.f32.vlgmr.msra.gmra.mrb[6].mxu1 %vm939_vm2, %v4487_v46 }
 0x35c   : > { %3279 = vmatpush3.msra.mxu1 %v4477_v36  ;;  %3280 = vmatprep.mubr.msk.f32.mxu1 %vm4031_vm0, %v4030_v52 }
 0x35d   : > { %3283 = vmatprep.subr.mxu1 %v4030_v52 }
 0x35e   : > { %v4495_v47 = vpop.eup %3697 }
 0x35f   : > { %3281 = vmatmul.mubr.msk.f32.vlgmr.msra.gmra.mrb[8].mxu1 %vm939_vm2, %v4495_v47 }
 0x360   : > { %3285 = vmatprep.mubr.msk.f32.mxu1 %vm4031_vm0, %v4030_v52 }
 0x363   : > { %3284 = vmatpush3.xpose.msk.msra.mxu1 %vm786_vm1, %v1115_v45 }
 0x364   : > { %3288 = vmatprep.subr.mxu1 %v4030_v52 }
 0x366   : > { %3286 = vmatmul.mubr.msk.f32.vlgmr.msra.gmra.mrb[10].mxu1 %vm786_vm1, %v1113_v48 }
 0x367   : > { %3289 = vmatpush3.xpose.msk.msra.mxu1 %vm786_vm1, %v1193_v51  ;;  %3290 = vmatprep.mubr.msk.f32.mxu1 %vm4031_vm0, %v4030_v52 }
 0x368   : > { %3293 = vmatprep.subr.mxu1 %v4030_v52 }
 0x36a   : > { %3291 = vmatmul.mubr.msk.f32.vlgmr.msra.gmra.mrb[12].mxu1 %vm786_vm1, %v1191_v49 }
 0x36b   : > { %3294 = vmatpush3.msra.mxu1 %v1288_v53  ;;  %3295 = vmatprep.mubr.msk.f32.mxu1 %vm4031_vm0, %v4030_v52 }
 0x36c   : > { %3298 = vmatprep.subr.mxu1 %v4030_v52 }
 0x42e   : > { %v4512_v54 = vpop.f32.mrb[6].mxu1 }
 0x42f   : > { %v3277_v55 = vpop.f32.mrb[7].mxu1 }
 0x432   : > { %v4514_v56 = vpop.f32.mrb[8].mxu1 }
 0x433   : > { %v3282_v57 = vpop.f32.mrb[9].mxu1 }
 0x434   : > { %v955_v57 = vsel %vm939_vm2, %v4495_v47, 0.0  ;;  %v1446_v47 = vld [vmem:[#allocation10 + $0x30] sm:$0xff] }
 0x439   : > { %v1186_v58 = vpop.f32.mrb[10].mxu1 }
 0x43a   : > { %v3287_v59 = vpop.f32.mrb[11].mxu1  ;;  %v1268_v60 = vsel %vm939_vm2, %v1186_v58, -inf }
 0x43b   : > { %1269 = vmax.xlane.f32.xlu1 %v1268_v60  ;;  %v1444_v60 = vld [vmem:[#allocation10 + $0x20] sm:$0xff] }
 0x43d   : > { %v1264_v61 = vpop.f32.mrb[12].mxu1 }
 0x43e   : > { %v3292_v62 = vpop.f32.mrb[13].mxu1  ;;  %v1271_v63 = vsel %vm939_vm2, %v1264_v61, -inf }
 0x43f   : > { %1272 = vmax.xlane.f32.xlu0 %v1271_v63  ;;  %v1447_v63 = vld [vmem:[#allocation10 + $0x38] sm:$0xff] }
 0x44c   : > { %1612 = vrot.lane.b32.xlu1 %v4440_v7, %s4033_s23 }
 0x450   : > { %1610 = vrot.lane.b32.xlu1 %v4444_v9, %s4033_s23 }
 0x454   : > { %1690 = vrot.lane.b32.xlu1 %v4451_v14, %s4033_s23 }
 0x455   : > { %1364 = vrot.lane.b32.xlu0 %v4477_v36, %s4032_s12  ;;  %s3009_s12 = sshll.u32 %s4109_s13, 8  ;;  %s4035_s13 = smov [#allocation14]  }
 0x456   : > { %s4668_s18 = scalar_lea.hbm %s4781_s29, %s3009_s12  ;;  %s3941_s20 = sshll.u32 %s4035_s13, 4  ;;  %s3942_s20 = int_to_ptr.vmem [resolvable:$false] %s3941_s20 }
 0x457   : > { %s3943_s28 = scalar_lea.vmem %s3942_s20, 512  ;;  %p3944_p13 = scmp.lt.s32.totalorder %s4670_s8, %s3942_s20 }
 0x458   : > { %1688 = vrot.lane.b32.xlu1 %v4459_v18, %s4033_s23  ;;  %p3945_p9 = scmp.lt.s32.totalorder %s3943_s28, %s3937_s1 }
 0x45a   : > { %p3946_p7 = por %p3945_p9, %p3944_p13 }
 0x45c   : > { %p3947_p12 = pnand %p3946_p7, %p3940_p11 }
 0x4c8   : > { %v1270_v0 = vpop.xlane.xlu1 %1269 }
 0x4c9   : > { %v1274_v1 = vsub.f32 %v1186_v58, %v1270_v0  ;;  %v3487_v0 = vpack.c.bf16 %v1447_v63, %v1446_v47  ;;  %v2995_v47 = vld [vmem:[%s4721_s7 + $0x3] ss:$0 sm:$0xff] }
 0x4cb   : > { %v1276_v2 = vmul.f32 1.442695, %v1274_v1  ;;  %v1108_v1 = vld [vmem:[#allocation10] sm:$0xff] }
 0x4cc   : > { %v1273_v3 = vpop.xlane.xlu0 %1272  ;;  %v1613_v6 = vpop.permute.xlu1 %1612 }
 0x4cd   : > { %3699 = vpow2.f32 %v1276_v2  ;;  %v1275_v4 = vsub.f32 %v1264_v61, %v1273_v3  ;;  %v1445_v61 = vld [vmem:[#allocation10 + $0x28] sm:$0xff] }
 0x4ce   : > { %v3483_v62 = vpack.c.bf16 %v1445_v61, %v1444_v60  ;;  %v1109_v2 = vld [vmem:[#allocation10 + $0x8] sm:$0xff] }
 0x4cf   : > { %v1278_v5 = vmul.f32 1.442695, %v1275_v4  ;;  %v3491_v3 = vpack.c.bf16 %v1109_v2, %v1108_v1 }
 0x4d0   : > { %v1365_v10 = vpop.permute.xlu0 %1364  ;;  %v1611_v11 = vpop.permute.xlu1 %1610  ;;  %3484 = vmatprep.subr.bf16.mxu0 %v3483_v62 }
 0x4d1   : > { %3701 = vpow2.f32 %v1278_v5  ;;  %3486 = vmatpush3.bf16.msra.mxu0 %v3483_v62 }
 0x4d2   : > { %3488 = vmatprep.subr.bf16.mxu0 %v3487_v0 }
 0x4d4   : > { %v1691_v13 = vpop.permute.xlu1 %1690 }
 0x4d5   : > { %3490 = vmatpush3.bf16.msra.mxu0 %v3487_v0 }
 0x4d6   : > { %3492 = vmatprep.subr.bf16.mxu0 %v3491_v3 }
 0x4d7   : > { %v4528_v8 = vpop.eup %3699 }
 0x4d8   : > { %3296 = vmatmul.mubr.msk.f32.vlgmr.msra.gmra.mrb[14].mxu1 %vm939_vm2, %v4528_v8  ;;  %v1689_v15 = vpop.permute.xlu1 %1688  ;;  %v1280_v55 = vsel %vm939_vm2, %v4528_v8, 0.0 }
 0x4d9   : > { %3299 = vmatpush3.msra.mxu1 %v1365_v10  ;;  %3300 = vmatprep.mubr.msk.f32.mxu1 %vm4031_vm0, %v4030_v52 }
 0x4da   : > { %3325 = vmatprep.subr.mxu1 %v4030_v52 }
 0x4db   : > { %v4535_v12 = vpop.eup %3701 }
 0x4dc   : > { %3301 = vmatmul.mubr.msk.f32.vlgmr.msra.gmra.mrb[16].mxu1 %vm939_vm2, %v4535_v12  ;;  %v1283_v58 = vsel %vm939_vm2, %v4535_v12, 0.0 }
 0x4dd   : > { %3327 = vmatprep.mubr.msk.f32.mxu1 %vm4031_vm0, %v4030_v52 }
 0x4e0   : > { %3326 = vmatpush3.xpose.msk.msra.mxu1 %vm786_vm1, %v1613_v6 }
 0x4e1   : > { %3330 = vmatprep.subr.mxu1 %v4030_v52 }
 0x4e3   : > { %3328 = vmatmul.mubr.msk.f32.vlgmr.msra.gmra.mrb[18].mxu1 %vm786_vm1, %v1611_v11 }
 0x4e4   : > { %3331 = vmatpush3.xpose.msk.msra.mxu1 %vm786_vm1, %v1691_v13  ;;  %3332 = vmatprep.mubr.msk.f32.mxu1 %vm4031_vm0, %v4030_v52 }
 0x4e5   : > { %3335 = vmatprep.subr.mxu1 %v4030_v52 }
 0x4e7   : > { %3333 = vmatmul.mubr.msk.f32.vlgmr.msra.gmra.mrb[20].mxu1 %vm786_vm1, %v1689_v15 }
 0x4e8   : > { %3337 = vmatprep.mubr.msk.f32.mxu1 %vm4031_vm0, %v4030_v52 }
 0x5ab   : > { %v4551_v16 = vpop.f32.mrb[14].mxu1 }
 0x5ac   : > { %v3297_v17 = vpop.f32.mrb[15].mxu1 }
 0x5af   : > { %v4553_v19 = vpop.f32.mrb[16].mxu1 }
 0x5b0   : > { %v3302_v20 = vpop.f32.mrb[17].mxu1 }
 0x5b6   : > { %v1684_v21 = vpop.f32.mrb[18].mxu1 }
 0x5b7   : > { %v3329_v22 = vpop.f32.mrb[19].mxu1  ;;  %v1766_v23 = vsel %vm939_vm2, %v1684_v21, -inf }
 0x5b8   : > { %1767 = vmax.xlane.f32.xlu1 %v1766_v23 }
 0x5ba   : > { %v1762_v24 = vpop.f32.mrb[20].mxu1 }
 0x5bb   : > { %v3334_v25 = vpop.f32.mrb[21].mxu1  ;;  %v1769_v27 = vsel %vm939_vm2, %v1762_v24, -inf }
 0x5bc   : > { %1770 = vmax.xlane.f32.xlu0 %v1769_v27 }
 0x5c9   : > { %1860 = vrot.lane.b32.xlu1 %v4477_v36, %s4033_s23 }
 0x5cd   : > { %2029 = vrot.lane.b32.xlu1 %v4440_v7, %s4034_s14 }
 0x5d1   : > { %2107 = vrot.lane.b32.xlu1 %v4451_v14, %s4034_s14 }
 0x5d2   : > { %1784 = vrot.lane.b32.xlu0 %v4479_v38, %s4033_s23 }
 0x5d6   : > { %2027 = vrot.lane.b32.xlu0 %v4444_v9, %s4034_s14 }
 0x5da   : > { %2105 = vrot.lane.b32.xlu0 %v4459_v18, %s4034_s14 }
 0x645   : > { %v1768_v28 = vpop.xlane.xlu1 %1767 }
 0x646   : > { %v1772_v29 = vsub.f32 %v1684_v21, %v1768_v28 }
 0x648   : > { %v1774_v30 = vmul.f32 1.442695, %v1772_v29  ;;  %v1110_v29 = vld [vmem:[#allocation10 + $0x10] sm:$0xff] }
 0x649   : > { %v1771_v31 = vpop.xlane.xlu0 %1770  ;;  %v1861_v34 = vpop.permute.xlu1 %1860 }
 0x64a   : > { %3703 = vpow2.f32 %v1774_v30  ;;  %v1773_v32 = vsub.f32 %v1762_v24, %v1771_v31  ;;  %v1111_v30 = vld [vmem:[#allocation10 + $0x18] sm:$0xff] }
 0x64c   : > { %v1776_v33 = vmul.f32 1.442695, %v1773_v32 }
 0x64d   : > { %v1785_v7 = vpop.permute.xlu0 %1784  ;;  %v2030_v18 = vpop.permute.xlu1 %2029 }
 0x64e   : > { %3705 = vpow2.f32 %v1776_v33  ;;  %3336 = vmatpush3.msra.mxu1 %v1785_v7  ;;  %v3495_v7 = vpack.c.bf16 %v1111_v30, %v1110_v29 }
 0x64f   : > { %3340 = vmatprep.subr.mxu1 %v4030_v52 }
 0x651   : > { %v2028_v35 = vpop.permute.xlu0 %2027  ;;  %v2108_v37 = vpop.permute.xlu1 %2107 }
 0x654   : > { %v3704_v14 = vpop.eup %3703 }
 0x655   : > { %3338 = vmatmul.mubr.msk.f32.vlgmr.msra.gmra.mrb[22].mxu1 %vm939_vm2, %v3704_v14  ;;  %v2106_v39 = vpop.permute.xlu0 %2105 }
 0x656   : > { %3341 = vmatpush3.msra.mxu1 %v1861_v34  ;;  %3342 = vmatprep.mubr.msk.f32.mxu1 %vm4031_vm0, %v4030_v52  ;;  %v1941_v34 = vld [vmem:[#allocation10 + $0x48] sm:$0xff] }
 0x657   : > { %3356 = vmatprep.subr.mxu1 %v4030_v52 }
 0x658   : > { %v3706_v9 = vpop.eup %3705 }
 0x659   : > { %3343 = vmatmul.mubr.msk.f32.vlgmr.msra.gmra.mrb[24].mxu1 %vm939_vm2, %v3706_v9  ;;  %v1781_v59 = vsel %vm939_vm2, %v3706_v9, 0.0 }
 0x65a   : > { %3358 = vmatprep.mubr.msk.f32.mxu1 %vm4031_vm0, %v4030_v52 }
 0x65d   : > { %3357 = vmatpush3.xpose.msk.msra.mxu1 %vm786_vm1, %v2030_v18 }
 0x65e   : > { %3361 = vmatprep.subr.mxu1 %v4030_v52 }
 0x660   : > { %3359 = vmatmul.mubr.msk.f32.vlgmr.msra.gmra.mrb[26].mxu1 %vm786_vm1, %v2028_v35 }
 0x661   : > { %3362 = vmatpush3.xpose.msk.msra.mxu1 %vm786_vm1, %v2108_v37  ;;  %3363 = vmatprep.mubr.msk.f32.mxu1 %vm4031_vm0, %v4030_v52  ;;  %v1942_v37 = vld [vmem:[#allocation10 + $0x50] sm:$0xff] }
 0x662   : > { %3366 = vmatprep.subr.mxu1 %v4030_v52 }
 0x664   : > { %3364 = vmatmul.mubr.msk.f32.vlgmr.msra.gmra.mrb[28].mxu1 %vm786_vm1, %v2106_v39  ;;  %v1943_v39 = vld [vmem:[#allocation10 + $0x58] sm:$0xff] }
 0x665   : > { %3368 = vmatprep.mubr.msk.f32.mxu1 %vm4031_vm0, %v4030_v52 }
 0x728   : > { %v4587_v40 = vpop.f32.mrb[22].mxu1 }
 0x729   : > { %v3339_v41 = vpop.f32.mrb[23].mxu1 }
 0x72c   : > { %v4589_v42 = vpop.f32.mrb[24].mxu1 }
 0x72d   : > { %v3344_v43 = vpop.f32.mrb[25].mxu1 }
 0x733   : > { %v2101_v44 = vpop.f32.mrb[26].mxu1 }
 0x734   : > { %v3360_v45 = vpop.f32.mrb[27].mxu1  ;;  %v2183_v48 = vsel %vm939_vm2, %v2101_v44, -inf }
 0x735   : > { %2184 = vmax.xlane.f32.xlu1 %v2183_v48  ;;  %v2357_v45 = vld [vmem:[#allocation10 + $0x60] sm:$0xff]  ;;  %v2358_v48 = vld [vmem:[#allocation10 + $0x68] sm:$0xff] }
 0x737   : > { %v2179_v49 = vpop.f32.mrb[28].mxu1 }
 0x738   : > { %v3365_v51 = vpop.f32.mrb[29].mxu1  ;;  %v2186_v53 = vsel %vm939_vm2, %v2179_v49, -inf }
 0x739   : > { %2187 = vmax.xlane.f32.xlu0 %v2186_v53 }
 0x746   : > { %2277 = vrot.lane.b32.xlu1 %v4477_v36, %s4034_s14  ;;  %v952_v36 = vsel %vm939_vm2, %v4487_v46, 0.0 }
 0x74f   : > { %2201 = vrot.lane.b32.xlu0 %v4479_v38, %s4034_s14  ;;  %v1778_v38 = vsel %vm939_vm2, %v3704_v14, 0.0  ;;  %v1940_v14 = vld [vmem:[#allocation10 + $0x40] sm:$0xff] }
 0x750   : > { %v3499_v18 = vpack.c.bf16 %v1941_v34, %v1940_v14  ;;  %v2503_v14 = vld [vmem:[#allocation11 + $0x68] sm:$0xff]  ;;  %v2505_v34 = vld [vmem:[#allocation11 + $0x78] sm:$0xff] }
 0x76a   : > { %1281 = vadd.xlane.f32.xlu1 %v1280_v55 }
 0x76e   : > { %956 = vadd.xlane.f32.xlu1 %v955_v57  ;;  %1284 = vadd.xlane.f32.xlu0 %v1283_v58 }
 0x772   : > { %1782 = vadd.xlane.f32.xlu1 %v1781_v59  ;;  %953 = vadd.xlane.f32.xlu0 %v952_v36 }
 0x776   : > { %1779 = vadd.xlane.f32.xlu0 %v1778_v38 }
 0x7c2   : > { %v2185_v46 = vpop.xlane.xlu1 %2184 }
 0x7c3   : > { %v2189_v4 = vsub.f32 %v2101_v44, %v2185_v46  ;;  %v3503_v44 = vpack.c.bf16 %v1943_v39, %v1942_v37  ;;  %v2507_v37 = vld [vmem:[#allocation11 + $0x88] sm:$0xff]  ;;  %v2509_v39 = vld [vmem:[#allocation11 + $0x98] sm:$0xff] }
 0x7c5   : > { %v2191_v5 = vmul.f32 1.442695, %v2189_v4  ;;  %v2491_v4 = vld [vmem:[#allocation11 + $0x8] sm:$0xff] }
 0x7c6   : > { %v2188_v6 = vpop.xlane.xlu0 %2187  ;;  %v2278_v13 = vpop.permute.xlu1 %2277 }
 0x7c7   : > { %3707 = vpow2.f32 %v2191_v5  ;;  %v2190_v8 = vsub.f32 %v2179_v49, %v2188_v6  ;;  %v2493_v5 = vld [vmem:[#allocation11 + $0x18] sm:$0xff]  ;;  %v2490_v6 = vld [vmem:[#allocation11] sm:$0xff] }
 0x7c9   : > { %v2193_v10 = vmul.f32 1.442695, %v2190_v8  ;;  %v3515_v8 = vpack.c.bf16 %v2493_v5, %v2491_v4 }
 0x7ca   : > { %v2202_v11 = vpop.permute.xlu0 %2201 }
 0x7cb   : > { %3709 = vpow2.f32 %v2193_v10  ;;  %3367 = vmatpush3.msra.mxu1 %v2202_v11  ;;  %v2492_v10 = vld [vmem:[#allocation11 + $0x10] sm:$0xff]  ;;  %v2495_v11 = vld [vmem:[#allocation11 + $0x28] sm:$0xff] }
 0x7cc   : > { %3371 = vmatprep.subr.mxu1 %v4030_v52 }
 0x7d1   : > { %v3708_v12 = vpop.eup %3707 }
 0x7d2   : > { %3369 = vmatmul.mubr.msk.f32.vlgmr.msra.gmra.mrb[30].mxu1 %vm939_vm2, %v3708_v12  ;;  %v2195_v15 = vsel %vm939_vm2, %v3708_v12, 0.0  ;;  %v2497_v12 = vld [vmem:[#allocation11 + $0x38] sm:$0xff] }
 0x7d3   : > { %3372 = vmatpush3.msra.mxu1 %v2278_v13  ;;  %2196 = vadd.xlane.f32.xlu0 %v2195_v15  ;;  %v3517_v13 = vpack.c.bf16 %v2492_v10, %v2490_v6  ;;  %v3519_v15 = vpack.c.bf16 %v2497_v12, %v2495_v11  ;;  %v2617_v6 = vld [vmem:[#allocation13 + $0x10] sm:$0xff]  ;;  %v2635_v10 = vld [vmem:[#allocation13 + $0xa0] sm:$0xff]  ;;  %v2636_v11 = vld [vmem:[#allocation13 + $0xa8] sm:$0xff] }
 0x7d4   : > { %3373 = vmatprep.mubr.msk.f32.mxu1 %vm4031_vm0, %v4030_v52  ;;  %3516 = vmatprep.subr.bf16.mxu1 %v3515_v8  ;;  %v2618_v8 = vld [vmem:[#allocation13 + $0x18] sm:$0xff] }
 0x7d5   : > { %v3710_v17 = vpop.eup %3709  ;;  %v3553_v12 = vpack.c.bf16 %v2618_v8, %v2617_v6 }
 0x7d6   : > { %3374 = vmatmul.mubr.msk.f32.vlgmr.msra.gmra.mrb[32].mxu1 %vm939_vm2, %v3710_v17  ;;  %v2198_v20 = vsel %vm939_vm2, %v3710_v17, 0.0  ;;  %v2494_v17 = vld [vmem:[#allocation11 + $0x20] sm:$0xff] }
 0x7d7   : > { %2199 = vadd.xlane.f32.xlu1 %v2198_v20  ;;  %2598 = vmatprep.mubr.f32.mxu1 %v4030_v52  ;;  %v2496_v20 = vld [vmem:[#allocation11 + $0x30] sm:$0xff] }
 0x7d8   : > { %3518 = vmatpush1.bf16.msra.mxu1 %v3517_v13  ;;  %v3555_v13 = vpack.c.bf16 %v2636_v11, %v2635_v10 }
 0x7d9   : > { %3520 = vmatprep.subr.bf16.mxu1 %v3519_v15  ;;  %v2619_v15 = vld [vmem:[#allocation13 + $0x20] sm:$0xff] }
 0x7f7   : > { %v1282_v21 = vpop.xlane.xlu1 %1281 }
 0x7f8   : > { %3711 = vrcp.f32 %v1282_v21  ;;  %v2499_v21 = vld [vmem:[#allocation11 + $0x48] sm:$0xff] }
 0x7fb   : > { %v1285_v22 = vpop.xlane.xlu0 %1284  ;;  %v957_v24 = vpop.xlane.xlu1 %956 }
 0x7fc   : > { %3713 = vrcp.f32 %v1285_v22  ;;  %v2501_v22 = vld [vmem:[#allocation11 + $0x58] sm:$0xff] }
 0x7ff   : > { %v954_v23 = vpop.xlane.xlu0 %953  ;;  %v1783_v33 = vpop.xlane.xlu1 %1782 }
 0x800   : > { %3715 = vrcp.f32 %v954_v23  ;;  %v2498_v23 = vld [vmem:[#allocation11 + $0x40] sm:$0xff] }
 0x801   : > { %3717 = vrcp.f32 %v957_v24  ;;  %v2500_v24 = vld [vmem:[#allocation11 + $0x50] sm:$0xff] }
 0x802   : > { %v3712_v25 = vpop.eup %3711 }
 0x803   : > { %v1780_v27 = vpop.xlane.xlu0 %1779  ;;  %v1442_v28 = vmul.f32 %v3712_v25, %v4551_v16  ;;  %v3525_v25 = vpack.c.bf16 %v2500_v24, %v2498_v23  ;;  %v2622_v23 = vld [vmem:[#allocation13 + $0x38] sm:$0xff]  ;;  %v2639_v24 = vld [vmem:[#allocation13 + $0xc0] sm:$0xff] }
 0x804   : > { %3719 = vrcp.f32 %v1780_v27 }
 0x805   : > { %3311 = vmatprep.mubr.msk.f32.mxu0 %vm786_vm1, %v1442_v28  ;;  %3721 = vrcp.f32 %v1783_v33 }
 0x806   : > { %v3714_v31 = vpop.eup %3713 }
 0x807   : > { %v1443_v32 = vmul.f32 %v3714_v31, %v4553_v19 }
 0x809   : > { %3312 = vmatmul.mubr.msk.f32.vlgmr.msra.gmra.mrb[4].mxu0 %vm786_vm1, %v1443_v32 }
 0x80a   : > { %v3716_v9 = vpop.eup %3715  ;;  %3494 = vmatpush3.bf16.msra.mxu0 %v3491_v3 }
 0x80b   : > { %3496 = vmatprep.subr.bf16.mxu0 %v3495_v7  ;;  %v1106_v16 = vmul.f32 %v3716_v9, %v4512_v54  ;;  %v3718_v35 = vpop.eup %3717  ;;  %v3507_v54 = vpack.c.bf16 %v2358_v48, %v2357_v45  ;;  %v3527_v9 = vpack.c.bf16 %v2505_v34, %v2503_v14  ;;  %v2513_v48 = vld [vmem:[#allocation11 + $0xb8] sm:$0xff] }
 0x80c   : > { %v1107_v43 = vmul.f32 %v3718_v35, %v4514_v56  ;;  %v2359_v56 = vld [vmem:[#allocation10 + $0x70] sm:$0xff] }
 0x80d   : > { %3322 = vmatprep.mubr.msk.f32.mxu0 %vm786_vm1, %v1106_v16  ;;  %v2502_v16 = vld [vmem:[#allocation11 + $0x60] sm:$0xff] }
 0x80e   : > { %v3720_v41 = vpop.eup %3719  ;;  %3498 = vmatpush3.bf16.msra.mxu0 %v3495_v7 }
 0x80f   : > { %v1938_v19 = vmul.f32 %v3720_v41, %v4587_v40  ;;  %3500 = vmatprep.subr.bf16.mxu0 %v3499_v18  ;;  %v3722_v49 = vpop.eup %3721  ;;  %v2360_v40 = vld [vmem:[#allocation10 + $0x78] sm:$0xff]  ;;  %v3531_v41 = vpack.c.bf16 %v2509_v39, %v2507_v37 }
 0x810   : > { %v1939_v51 = vmul.f32 %v3722_v49, %v4589_v42  ;;  %v3511_v53 = vpack.c.bf16 %v2360_v40, %v2359_v56  ;;  %v2512_v49 = vld [vmem:[#allocation11 + $0xb0] sm:$0xff]  ;;  %v2515_v56 = vld [vmem:[#allocation11 + $0xc8] sm:$0xff]  ;;  %v2517_v40 = vld [vmem:[#allocation11 + $0xd8] sm:$0xff] }
 0x811   : > { %3323 = vmatmul.mubr.msk.f32.vlgmr.msra.gmra.mrb[4].mxu0 %vm786_vm1, %v1107_v43  ;;  %v2508_v43 = vld [vmem:[#allocation11 + $0x90] sm:$0xff] }
 0x812   : > { %3502 = vmatpush3.bf16.msra.mxu0 %v3499_v18  ;;  %3353 = vmatprep.mubr.msk.f32.mxu0 %vm786_vm1, %v1938_v19  ;;  %v2504_v18 = vld [vmem:[#allocation11 + $0x70] sm:$0xff]  ;;  %v2506_v19 = vld [vmem:[#allocation11 + $0x80] sm:$0xff] }
 0x813   : > { %3504 = vmatprep.subr.bf16.mxu0 %v3503_v44  ;;  %v3529_v35 = vpack.c.bf16 %v2504_v18, %v2502_v16  ;;  %v3533_v45 = vpack.c.bf16 %v2508_v43, %v2506_v19  ;;  %v2626_v16 = vld [vmem:[#allocation13 + $0x58] sm:$0xff]  ;;  %v2643_v18 = vld [vmem:[#allocation13 + $0xe0] sm:$0xff] }
 0x816   : > { %3506 = vmatpush3.bf16.msra.mxu0 %v3503_v44  ;;  %v2511_v44 = vld [vmem:[#allocation11 + $0xa8] sm:$0xff] }
 0x817   : > { %3508 = vmatprep.subr.bf16.mxu0 %v3507_v54 }
 0x819   : > { %3354 = vmatmul.mubr.msk.f32.vlgmr.msra.gmra.mrb[4].mxu0 %vm786_vm1, %v1939_v51  ;;  %v3535_v51 = vpack.c.bf16 %v2513_v48, %v2511_v44 }
 0x81a   : > { %3510 = vmatpush3.bf16.msra.mxu0 %v3507_v54  ;;  %v2510_v54 = vld [vmem:[#allocation11 + $0xa0] sm:$0xff] }
 0x81b   : > { %3512 = vmatprep.subr.bf16.mxu0 %v3511_v53 }
 0x81e   : > { %3514 = vmatpush3.bf16.msra.mxu0 %v3511_v53  ;;  %v3537_v53 = vpack.c.bf16 %v2512_v49, %v2510_v54 }
 0x860   : > { %v2197_v55 = vpop.xlane.xlu0 %2196 }
 0x861   : > { %3723 = vrcp.f32 %v2197_v55  ;;  %v3539_v55 = vpack.c.bf16 %v2517_v40, %v2515_v56 }
 0x864   : > { %v2200_v57 = vpop.xlane.xlu1 %2199 }
 0x865   : > { %3725 = vrcp.f32 %v2200_v57  ;;  %v2514_v57 = vld [vmem:[#allocation11 + $0xc0] sm:$0xff] }
 0x86b   : > { %v3724_v58 = vpop.eup %3723 }
 0x86f   : > { %v3726_v42 = vpop.eup %3725 }
 0x8a5   : > { %v2273_v59 = vpop.f32.mrb[30].mxu1 }
 0x8a6   : > { %v2355_v36 = vmul.f32 %v3724_v58, %v2273_v59  ;;  %v3370_v38 = vpop.f32.mrb[31].mxu1  ;;  %v2516_v58 = vld [vmem:[#allocation11 + $0xd0] sm:$0xff]  ;;  %v2519_v59 = vld [vmem:[#allocation11 + $0xe8] sm:$0xff] }
 0x8a7   : > { %v3541_v38 = vpack.c.bf16 %v2516_v58, %v2514_v57 }
 0x8a8   : > { %3384 = vmatprep.mubr.msk.f32.mxu0 %vm786_vm1, %v2355_v36  ;;  %v2521_v36 = vld [vmem:[#allocation11 + $0xf8] sm:$0xff] }
 0x8a9   : > { %v2349_v60 = vpop.f32.mrb[32].mxu1 }
 0x8aa   : > { %v2356_v61 = vmul.f32 %v3726_v42, %v2349_v60  ;;  %v3375_v62 = vpop.f32.mrb[33].mxu1  ;;  %v3543_v42 = vpack.c.bf16 %v2521_v36, %v2519_v59  ;;  %v2518_v60 = vld [vmem:[#allocation11 + $0xe0] sm:$0xff] }
 0x8ab   : > { %v2627_v36 = vld [vmem:[#allocation13 + $0x60] sm:$0xff] }
 0x8ac   : > { %3385 = vmatmul.mubr.msk.f32.vlgmr.msra.gmra.mrb[4].mxu0 %vm786_vm1, %v2356_v61  ;;  %v2520_v61 = vld [vmem:[#allocation11 + $0xf0] sm:$0xff] }
 0x8ad   : > { %v3545_v62 = vpack.c.bf16 %v2520_v61, %v2518_v60  ;;  %v2645_v60 = vld [vmem:[#allocation13 + $0xf0] sm:$0xff] }
 0x97f   : > { %v3386_v63 = vpop.f32.mrb[4].mxu0 }
 0x980   : > { %v2450_v0 = vadd.f32 %v3386_v63, %v2995_v47  ;;  %v2433_v1 = vpop.f32.mrb[5].mxu0  ;;  %v2632_v63 = vld [vmem:[#allocation13 + $0x88] sm:$0xff] }
 0x981   : > { %v2449_v2 = vadd.f32 %v2995_v47, %v2433_v1  ;;  %v2631_v47 = vld [vmem:[#allocation13 + $0x80] sm:$0xff] }
 0x982   : > { %v2452_v3 = vadd.f32 %v2450_v0, %v4426_v50  ;;  %v3521_v50 = vpack.c.bf16 %v2496_v20, %v2494_v17  ;;  %v2615_v0 = vld [vmem:[#allocation13] sm:$0xff]  ;;  %v3547_v1 = vpack.c.bf16 %v2632_v63, %v2631_v47  ;;  %v2620_v17 = vld [vmem:[#allocation13 + $0x28] sm:$0xff]  ;;  %v2637_v20 = vld [vmem:[#allocation13 + $0xb0] sm:$0xff]  ;;  %v2524_v63 = vlaneseq }
 0x983   : > { %v2451_v46 = vadd.f32 %v2449_v2, %v4419_v26  ;;  %v3523_v26 = vpack.c.bf16 %v2501_v22, %v2499_v21  ;;  %v2616_v2 = vld [vmem:[#allocation13 + $0x8] sm:$0xff]  ;;  %v2638_v21 = vld [vmem:[#allocation13 + $0xb8] sm:$0xff]  ;;  %v3557_v22 = vpack.c.bf16 %v2620_v17, %v2619_v15 }
 0x984   : > { %2457 = vadd.xlane.f32.xlu1 %v2452_v3  ;;  %3522 = vmatpush1.bf16.msra.mxu1 %v3521_v50  ;;  %v3549_v4 = vpack.c.bf16 %v2616_v2, %v2615_v0  ;;  %v3559_v50 = vpack.c.bf16 %v2638_v21, %v2637_v20  ;;  %v2525_v0 = vshrl.u32 %v2524_v63, 7 }
 0x985   : > { %2455 = vadd.xlane.f32.xlu0 %v2451_v46  ;;  %3524 = vmatprep.subr.bf16.mxu1 %v3523_v26  ;;  %v2621_v26 = vld [vmem:[#allocation13 + $0x30] sm:$0xff] }
 0x986   : > { %3548 = vmatprep.subr.bf16.mxu0 %v3547_v1  ;;  %v2526_v1 = vsub.s32 0, %v2525_v0  ;;  %v2530_v2 = vsub.s32 1, %v2525_v0 }
 0x987   : > { %3550 = vmatpush3.bf16.msra.mxu0 %v3549_v4 }
 0x988   : > { %3526 = vmatpush1.bf16.msra.mxu1 %v3525_v25  ;;  %v2640_v25 = vld [vmem:[#allocation13 + $0xc8] sm:$0xff] }
 0x989   : > { %3528 = vmatprep.subr.bf16.mxu1 %v3527_v9  ;;  %v2625_v9 = vld [vmem:[#allocation13 + $0x50] sm:$0xff] }
 0x98a   : > { %v3569_v37 = vpack.c.bf16 %v2626_v16, %v2625_v9 }
 0x98c   : > { %3530 = vmatpush1.bf16.msra.mxu1 %v3529_v35  ;;  %v2644_v35 = vld [vmem:[#allocation13 + $0xe8] sm:$0xff] }
 0x98d   : > { %3532 = vmatprep.subr.bf16.mxu1 %v3531_v41  ;;  %v3571_v39 = vpack.c.bf16 %v2644_v35, %v2643_v18 }
 0x990   : > { %3534 = vmatpush1.bf16.msra.mxu1 %v3533_v45 }
 0x991   : > { %3536 = vmatprep.subr.bf16.mxu1 %v3535_v51  ;;  %v2996_v51 = vld [vmem:[%s4721_s7 + $0x4] ss:$0 sm:$0xff] }
 0x994   : > { %3538 = vmatpush1.bf16.msra.mxu1 %v3537_v53  ;;  %v2997_v53 = vld [vmem:[%s4721_s7 + $0x5] ss:$0 sm:$0xff] }
 0x995   : > { %3540 = vmatprep.subr.bf16.mxu1 %v3539_v55 }
 0x998   : > { %3542 = vmatpush1.bf16.msra.mxu1 %v3541_v38  ;;  %v2628_v38 = vld [vmem:[#allocation13 + $0x68] sm:$0xff] }
 0x999   : > { %3544 = vmatprep.subr.bf16.mxu1 %v3543_v42  ;;  %v3573_v42 = vpack.c.bf16 %v2628_v38, %v2627_v36 }
 0x99c   : > { %3546 = vmatpush1.bf16.msra.mxu1 %v3545_v62  ;;  %v2630_v62 = vld [vmem:[#allocation13 + $0x78] sm:$0xff] }
 0xa11   : > { %v2458_v27 = vpop.xlane.xlu1 %2457 }
 0xa12   : > { %v2461_v28 = vmul.f32 0.0078125, %v2458_v27  ;;  %v2456_v29 = vpop.xlane.xlu0 %2455  ;;  %v3561_v27 = vpack.c.bf16 %v2622_v23, %v2621_v26 }
 0xa13   : > { %v2460_v30 = vmul.f32 0.0078125, %v2456_v29  ;;  %v2623_v29 = vld [vmem:[#allocation13 + $0x40] sm:$0xff] }
 0xa14   : > { %v4634_v31 = vsub.f32 %v2452_v3, %v2461_v28  ;;  %v2633_v3 = vld [vmem:[#allocation13 + $0x90] sm:$0xff]  ;;  %v3563_v28 = vpack.c.bf16 %v2640_v25, %v2639_v24 }
 0xa15   : > { %v4636_v32 = vsub.f32 %v2451_v46, %v2460_v30  ;;  %v2634_v46 = vld [vmem:[#allocation13 + $0x98] sm:$0xff]  ;;  %v2624_v30 = vld [vmem:[#allocation13 + $0x48] sm:$0xff] }
 0xa16   : > { %v2465_v33 = vmul.f32 %v4634_v31, %v4634_v31  ;;  %v3551_v5 = vpack.c.bf16 %v2634_v46, %v2633_v3  ;;  %v3565_v14 = vpack.c.bf16 %v2624_v30, %v2623_v29 }
 0xa17   : > { %v2464_v7 = vmul.f32 %v4636_v32, %v4636_v32 }
 0xa18   : > { %2468 = vadd.xlane.f32.xlu1 %v2465_v33  ;;  %3552 = vmatprep.subr.bf16.mxu0 %v3551_v5  ;;  %v2641_v33 = vld [vmem:[#allocation13 + $0xd0] sm:$0xff] }
 0xa19   : > { %2466 = vadd.xlane.f32.xlu0 %v2464_v7  ;;  %3554 = vmatpush3.bf16.msra.mxu0 %v3553_v12  ;;  %v2642_v7 = vld [vmem:[#allocation13 + $0xd8] sm:$0xff] }
 0xa1a   : > { %3556 = vmatprep.subr.bf16.mxu0 %v3555_v13  ;;  %v3567_v34 = vpack.c.bf16 %v2642_v7, %v2641_v33 }
 0xa1d   : > { %3558 = vmatpush3.bf16.msra.mxu0 %v3557_v22 }
 0xa1e   : > { %3560 = vmatprep.subr.bf16.mxu0 %v3559_v50  ;;  %v2998_v50 = vld [vmem:[%s4721_s7 + $0x6] ss:$0 sm:$0xff] }
 0xa21   : > { %3562 = vmatpush3.bf16.msra.mxu0 %v3561_v27 }
 0xa22   : > { %3564 = vmatprep.subr.bf16.mxu0 %v3563_v28 }
 0xa25   : > { %3566 = vmatpush3.bf16.msra.mxu0 %v3565_v14 }
 0xa26   : > { %3568 = vmatprep.subr.bf16.mxu0 %v3567_v34 }
 0xa29   : > { %3570 = vmatpush3.bf16.msra.mxu0 %v3569_v37 }
 0xa2a   : > { %3572 = vmatprep.subr.bf16.mxu0 %v3571_v39 }
 0xa2d   : > { %3574 = vmatpush3.bf16.msra.mxu0 %v3573_v42 }
 0xaa5   : > { %v2469_v41 = vpop.xlane.xlu1 %2468 }
 0xaa6   : > { %v2471_v19 = vmul.f32 0.0078125, %v2469_v41  ;;  %v2467_v43 = vpop.xlane.xlu0 %2466 }
 0xaa7   : > { %v2470_v44 = vmul.f32 0.0078125, %v2467_v43 }
 0xaa8   : > { %v2473_v45 = vadd.f32 1e-05, %v2471_v19 }
 0xaa9   : > { %v2472_v48 = vadd.f32 1e-05, %v2470_v44 }
 0xaaa   : > { %3727 = vrsqrt.f32 %v2473_v45 }
 0xaab   : > { %3729 = vrsqrt.f32 %v2472_v48 }
 0xab4   : > { %v3728_v54 = vpop.eup %3727 }
 0xab5   : > { %v3730_v49 = vpop.eup %3729  ;;  %v2477_v40 = vmul.f32 %v3728_v54, %v4634_v31  ;;  %v2629_v31 = vld [vmem:[#allocation13 + $0x70] sm:$0xff]  ;;  %v2999_v54 = vld [vmem:[%s4721_s7 + $0x7] ss:$0 sm:$0xff] }
 0xab6   : > { %v2476_v56 = vmul.f32 %v3730_v49, %v4636_v32  ;;  %v2646_v32 = vld [vmem:[#allocation13 + $0xf8] sm:$0xff]  ;;  %v3577_v47 = vpack.c.bf16 %v2630_v62, %v2629_v31 }
 0xab7   : > { %v2483_v58 = vmul.f32 %v2996_v51, %v2477_v40  ;;  %v3575_v61 = vpack.c.bf16 %v2646_v32, %v2645_v60 }
 0xab8   : > { %v2482_v55 = vmul.f32 %v2996_v51, %v2476_v56  ;;  %v3000_v51 = vld [vmem:[%s4721_s7 + $0x8] ss:$0 sm:$0xff] }
 0xab9   : > { %v2489_v59 = vadd.f32 %v2997_v53, %v2483_v58  ;;  %3576 = vmatprep.subr.bf16.mxu0 %v3575_v61 }
 0xaba   : > { %v2488_v57 = vadd.f32 %v2997_v53, %v2482_v55  ;;  %3578 = vmatpush3.bf16.msra.mxu0 %v3577_v47 }
 0xabc   : > { %2599 = vmatmul.mubr.f32.vlgmr.msra.gmra.mrb[34].mxu1 %v2488_v57 }
 0xabd   : > { %2604 = vmatprep.mubr.f32.mxu1 %v4030_v52  ;;  %v2522_v52 = vld [vmem:[%s4779_s5] sm:$0x3] }
 0xabe   : > { %v2527_v3 = vrot.slane %v2522_v52, %v2526_v1  ;;  %v2531_v46 = vrot.slane %v2522_v52, %v2530_v2 }
 0xac0   : > { %2605 = vmatmul.mubr.f32.gmra.mrb[36].mxu1 %v2489_v59 }
 0xb8f   : > { %v2600_v4 = vpop.f32.mrb[34].mxu1 }
 0xb90   : > { %v2601_v5 = vadd.f32 %v2600_v4, %v2527_v3  ;;  %v2602_v6 = vpop.f32.mrb[35].mxu1 }
 0xb91   : > { %v2603_v8 = vadd.f32 %v2602_v6, %v2531_v46 }
 0xb92   : > { %v2611_v12 = vmax.f32 %v2601_v5, 0.0 }
 0xb93   : > { %v2612_v10 = vmax.f32 %v2603_v8, 0.0  ;;  %v2606_v11 = vpop.f32.mrb[36].mxu1 }
 0xb94   : > { %v2607_v13 = vadd.f32 %v2606_v11, %v2527_v3  ;;  %v2608_v15 = vpop.f32.mrb[37].mxu1 }
 0xb95   : > { %v2609_v17 = vadd.f32 %v2608_v15, %v2531_v46  ;;  %2716 = vmatprep.mubr.f32.mxu0 %v2612_v10 }
 0xb96   : > { %2717 = vmatmul.mubr.f32.vlgmr.msra.gmra.mrb[6].mxu0 %v2611_v12  ;;  %v2613_v21 = vmax.f32 %v2607_v13, 0.0 }
 0xb97   : > { %v2614_v20 = vmax.f32 %v2609_v17, 0.0 }
 0xb99   : > { %2721 = vmatprep.mubr.f32.mxu0 %v2614_v20 }
 0xb9a   : > { %2722 = vmatmul.mubr.f32.gmra.mrb[8].mxu0 %v2613_v21 }
 0xc69   : > { %v3152_v22 = vpop.f32.mrb[6].mxu0 }
 0xc6a   : > { %v3153_v26 = vpop.f32.mrb[7].mxu0 }
 0xc6b   : > { %v3154_v23 = vadd.f32 %v3153_v26, %v3152_v22 }
 0xc6d   : > { %v2719_v24 = vadd.f32 %v3154_v23, %v2998_v50  ;;  %v3155_v25 = vpop.f32.mrb[8].mxu0 }
 0xc6e   : > { %v3156_v27 = vpop.f32.mrb[9].mxu0 }
 0xc6f   : > { %v3157_v28 = vadd.f32 %v3156_v27, %v3155_v25  ;;  %v2727_v29 = vadd.f32 %v2719_v24, %v2488_v57 }
 0xc71   : > { %v2724_v30 = vadd.f32 %v3157_v28, %v2998_v50  ;;  %2731 = vadd.xlane.f32.xlu0 %v2727_v29 }
 0xc73   : > { %v2728_v33 = vadd.f32 %v2724_v30, %v2489_v59 }
 0xc75   : > { %2733 = vadd.xlane.f32.xlu1 %v2728_v33 }
 0xcfe   : > { %v2732_v7 = vpop.xlane.xlu0 %2731 }
 0xcff   : > { %v2735_v14 = vmul.f32 0.0078125, %v2732_v7 }
 0xd01   : > { %v2737_v34 = vsub.f32 %v2727_v29, %v2735_v14 }
 0xd02   : > { %v2734_v9 = vpop.xlane.xlu1 %2733 }
 0xd03   : > { %v2736_v16 = vmul.f32 0.0078125, %v2734_v9  ;;  %v2739_v18 = vmul.f32 %v2737_v34, %v2737_v34 }
 0xd05   : > { %v2738_v35 = vsub.f32 %v2728_v33, %v2736_v16  ;;  %2741 = vadd.xlane.f32.xlu0 %v2739_v18 }
 0xd07   : > { %v2740_v37 = vmul.f32 %v2738_v35, %v2738_v35 }
 0xd09   : > { %2743 = vadd.xlane.f32.xlu1 %v2740_v37 }
 0xd92   : > { %v2742_v39 = vpop.xlane.xlu0 %2741 }
 0xd93   : > { %v2745_v41 = vmul.f32 0.0078125, %v2742_v39 }
 0xd95   : > { %v2747_v19 = vadd.f32 1e-05, %v2745_v41 }
 0xd96   : > { %v2744_v43 = vpop.xlane.xlu1 %2743 }
 0xd97   : > { %3731 = vrsqrt.f32 %v2747_v19  ;;  %v2746_v44 = vmul.f32 0.0078125, %v2744_v43 }
 0xd99   : > { %v2748_v45 = vadd.f32 1e-05, %v2746_v44 }
 0xd9b   : > { %3733 = vrsqrt.f32 %v2748_v45 }
 0xda1   : > { %v3732_v48 = vpop.eup %3731 }
 0xda2   : > { %v2751_v49 = vmul.f32 %v3732_v48, %v2737_v34 }
 0xda4   : > { %v2757_v56 = vmul.f32 %v2999_v54, %v2751_v49 }
 0xda5   : > { %v3734_v40 = vpop.eup %3733 }
 0xda6   : > { %v2763_v53 = vadd.f32 %v3000_v51, %v2757_v56  ;;  %v2752_v55 = vmul.f32 %v3734_v40, %v2738_v35 }
 0xda8   : > { %v2758_v57 = vmul.f32 %v2999_v54, %v2752_v55  ;;  %2765 = vst [vmem:[%s485_s3] sm:$0xff] %v2763_v53 }
 0xdaa   : > { %v2764_v58 = vadd.f32 %v3000_v51, %v2758_v57 }
 0xdac   : > { %2766 = vst [vmem:[%s485_s3 + $0x8] sm:$0xff] %v2764_v58 }
 0xdad   : > { %3950 = shalt.err (!%p3947_p12)
}
 0xdae   : > { %s3951_s9 = scalar_lea.hbm %s4668_s18, 256  ;;  %s3955_s5 = scalar_lea.hbm %s4781_s29, 512 }
 0xdaf   : > { %p3952_p8 = scmp.ne.s32.totalorder %s4668_s18, %s3951_s9  ;;  %p3956_p2 = scmp.lt.u32.totalorder %s4668_s18, %s4781_s29 }
 0xdb0   : > { %p3957_p6 = scmp.lt.u32.totalorder %s3955_s5, %s3951_s9  ;;  %p3959_p5 = scmp.lt.u32.totalorder %s3951_s9, %s4668_s18 }
 0xdb1   : > { %p3953_p10 = pnand %p3952_p8, %p4782_p1 }
 0xdb2   : > { %p3958_p3 = por %p3957_p6, %p3956_p2 }
 0xdb3   : > { %p3954_p0 = pneg %p3953_p10 }
 0xdb4   : > { %p3960_p4 = por %p3959_p5, %p3958_p3 }
 0xdb6   : > { %p3961_p11 = pnand %p3960_p4, %p3954_p0 }
 0xdb8   : > { %3964 = shalt.err (!%p3961_p11)
}
 0xdb9   : > { %s4036_s27 = smov 128   ;;  %s4037_s15 = smov 8  }
 0xdba   : > { %3607 = dma.vmem_to_hbm [thread:$0]  (%p4782_p1), %s4670_s8, 256, %s4668_s18, %s2768_s22, %s4036_s27, %s4036_s27, %s4037_s15  }
 0xdbb PF: > { %s4783_s16 = sld [smem:[#allocation20_spill]]  ;;  %s4784_s26 = sld [smem:[#allocation22_spill]] }
 0xdbc   : > { %s4785_s12 = sld [smem:[#allocation21_spill]] }
 0xdc1   : > { %s2796_s3 = sand.u32 1, %s4783_s16   ;;  %p4786_p13 = scmp.ne.s32.totalorder %s4784_s26, 0 }
 0xdc2   : > { %p4787_p9 = scmp.ge.s32.totalorder %s4785_s12, 2  ;;  %s2797_s23 = scalar_lea.sflag [#allocation4], %s2796_s3 }
 0xdc4   : > { %p3633_p7 = pnand %p4787_p9, %p4786_p13 }
 0xdc6   : > { %3998 = dma.done.wait (!%p3633_p7), %s2797_s23, 256  }
 0xdc7   : > { %4000 = vsyncadd (!%p3633_p7), %s2797_s23, 4294967040  ;;  %s4788_s12 = sld [smem:[#allocation23_spill]]  ;;  %s4789_s14 = sld [smem:[#allocation24_spill]] }
 0xdc8   : > { %s4790_s30 = smov %s4007_s10  ;;  %s4791_s10 = smov %s4011_s11 }
 0xdcd   : > { %p27_p12 = scmp.ge.s32.totalorder %s4788_s12, 4   ;;  %s4792_s11 = smov %s4789_s14 }
 0xdcf   :  { %29 = sbr.rel (!%p27_p12) target bundleno = 15 (0xf), region = 141 }
 0xdd6   :  { %2802 = vsyncpa [#allocation3], 1 }
 0xdd7   :  { %2804 = vsyncpa [#allocation3 + $0x1], 1 }
 0xdd8   :  { %2805 = vsyncpa [#allocation6], 1 }
 0xdd9   :  { %2807 = vsyncpa [#allocation6 + $0x1], 1 }
 0xdda   :  { %2808 = vsyncpa [#allocation9], 1 }
 0xddb   :  { %2809 = vsyncpa [#allocation12], 1 }
 0xddc   :  { %2810 = vsyncpa [#allocation4], 1 }
 0xddd   :  { %2812 = vsyncpa [#allocation4 + $0x1], 1 }

</bundles_post_ra>
